<compile_context>
chip_gen: v7x
topology: tpu7x:2x2x1
jax: 0.10.0
libtpu: 0.0.40
codegen_flags: <defaults>
</compile_context>

<pallas_src>
from functools import partial

import jax
import jax.numpy as jnp
from jax.experimental import pallas as pl
from jax.experimental.pallas import tpu as pltpu


# ----------------------------------------------------------------------------
# Pallas kernel: whole forward pass (bi-LSTM recurrence + fused epilogue)
# ----------------------------------------------------------------------------
def _decoder_kernel(z2d_ref, w_in_ref, b_in_ref, w_hh_ref, w_ep_ref, b_ep_ref,
                    out_ref, *, B, BP, T, H, O):
    HP2 = w_hh_ref.shape[0]                       # padded [fwd|bwd] carry width (128-aligned)

    # ---- hoisted input projection: ONE matmul gives gin for all steps & both dirs.
    # Row t*BP+b of z2d is [z[b,t] | z[b,T-1-t]]; w_in routes the two halves to the
    # fwd/bwd gate columns, so this already IS the per-step gate input.
    gin_all = (jnp.dot(z2d_ref[...], w_in_ref[...],
                       preferred_element_type=jnp.float32)
               + b_in_ref[...])                   # (T*BP, 4*HP2)

    w_hh = w_hh_ref[...]                          # (HP2, 4*HP2) block-diagonal
    h = jnp.zeros((BP, HP2), jnp.float32)         # [h_fwd | h_bwd | 0-pad]
    c = jnp.zeros((BP, HP2), jnp.float32)         # [c_fwd | c_bwd | 0-pad]

    # ---- fully-unrolled recurrence: one fused MXU matmul per timestep; all row
    # slabs are 8-sublane aligned, all gate slices are 128-lane aligned.
    for t in range(T):
        gates = (gin_all[t * BP:(t + 1) * BP, :]
                 + jnp.dot(h, w_hh, preferred_element_type=jnp.float32))  # (BP, 4*HP2)
        s = jax.nn.sigmoid(gates[:, 0:3 * HP2])   # one wide EUP op for i|f|o
        i = s[:, 0 * HP2:1 * HP2]
        f = s[:, 1 * HP2:2 * HP2]
        o = s[:, 2 * HP2:3 * HP2]
        g = jnp.tanh(gates[:, 3 * HP2:4 * HP2])
        c = f * c + i * g
        h = o * jnp.tanh(c)

    # ---- fused epilogue: [h | c] @ w_ep -> [new_h | new_c | labels | 0-pad]
    hc = jnp.concatenate([h, c], axis=1)          # (BP, 2*HP2), lane-aligned halves
    red_lab = (jnp.dot(hc, w_ep_ref[...], preferred_element_type=jnp.float32)
               + b_ep_ref[...])                   # (BP, CE)

    labels0 = red_lab[0:1, 2 * H:2 * H + O]       # labels for batch row 0 only
    m = jnp.max(labels0, axis=1, keepdims=True)
    lse = m + jnp.log(jnp.sum(jnp.exp(labels0 - m), axis=1, keepdims=True))
    probs = labels0 - lse                         # log_softmax(labels[0])

    # ---- single lane-dense full store + one tiny masked store for the probs row
    out_ref[...] = red_lab                        # rows 0..B-1: [new_h|new_c|...]
    out_ref[B:B + 1, 0:O] = probs                 # row B, cols 0..O-1: probs


# ----------------------------------------------------------------------------
# Wrapper
# ----------------------------------------------------------------------------
@partial(jax.jit, static_argnames=("H", "O"))
def decoder_forward(z, fp, *, H, O):
    """z: (B, T, z_dim) batch-first float32.  Returns (probs, (new_h, new_c))."""
    B, T, D = z.shape
    BP = ((B + 1 + 7) // 8) * 8                   # 8-aligned, >= B+1 (spare probs row)
    CE = fp["w_ep"].shape[1]                      # epilogue / output lane width

    # both-direction time-major packing: row t*BP+b = [z[b,t] | z[b,T-1-t]]
    zf = jnp.transpose(z, (1, 0, 2))              # (T, B, D)
    zcat = jnp.concatenate([zf, zf[::-1]], axis=-1)          # (T, B, 2D)
    zcat = jnp.pad(zcat, ((0, 0), (0, BP - B), (0, 0)))      # sublane batch pad
    z2d = zcat.reshape(T * BP, 2 * D)

    vmem = pl.BlockSpec(memory_space=pltpu.MemorySpace.VMEM)
    args = (z2d, fp["w_in"], fp["b_in"], fp["w_hh"], fp["w_ep"], fp["b_ep"])

    out = pl.pallas_call(
        partial(_decoder_kernel, B=B, BP=BP, T=T, H=H, O=O),
        out_shape=jax.ShapeDtypeStruct((BP, CE), jnp.float32),
        in_specs=[vmem] * len(args),
        out_specs=vmem,
    )(*args)

    new_h = out[0:B, 0:H]
    new_c = out[0:B, H:2 * H]
    probs = out[B, 0:O]
    return probs, (new_h, new_c)


# ----------------------------------------------------------------------------
# Parameter fusion (host/XLA side, done once)
# ----------------------------------------------------------------------------
def fuse_params(p):
    """Build the padded / fused / block-diagonal weights consumed by the kernel."""
    H = p["wrh"].shape[1]                         # wrh: (2H, H) in-by-out
    O = p["whl"].shape[1]
    D = p["wih_f"].shape[0]
    HP2 = max(128, ((2 * H + 127) // 128) * 128)  # lane-padded carry width
    CE = max(128, ((2 * H + O + 127) // 128) * 128)
    G = 4 * HP2

    # PyTorch gate chunk order is i,f,g,o; kernel block order is [i, f, o, g]
    def chunks(w):
        return [w[:, k * H:(k + 1) * H] for k in range(4)]
    order = (0, 1, 3, 2)

    wif, wib = chunks(p["wih_f"]), chunks(p["wih_b"])
    whf, whb = chunks(p["whh_f"]), chunks(p["whh_b"])
    bf, bb = chunks(p["b_f"]), chunks(p["b_b"])

    w_in = jnp.zeros((2 * D, G), jnp.float32)     # rows 0:D feed fwd, D:2D feed bwd
    w_hh = jnp.zeros((HP2, G), jnp.float32)       # block-diag per gate per direction
    b_in = jnp.zeros((1, G), jnp.float32)
    for blk, k in enumerate(order):
        c0 = blk * HP2
        w_in = w_in.at[0:D, c0:c0 + H].set(wif[k])
        w_in = w_in.at[D:2 * D, c0 + H:c0 + 2 * H].set(wib[k])
        w_hh = w_hh.at[0:H, c0:c0 + H].set(whf[k])
        w_hh = w_hh.at[H:2 * H, c0 + H:c0 + 2 * H].set(whb[k])
        b_in = b_in.at[:, c0:c0 + H].set(bf[k])
        b_in = b_in.at[:, c0 + H:c0 + 2 * H].set(bb[k])

    # fold hiddenToLabel through reduce_h_W
    whl_f = jnp.dot(p["wrh"], p["whl"], precision="highest")              # (2H, O)
    bhl_f = jnp.dot(p["brh"], p["whl"], precision="highest") + p["bhl"]   # (1, O)

    # fused epilogue: [h | c](BP, 2*HP2) @ w_ep -> [new_h | new_c | labels | 0]
    w_ep = jnp.zeros((2 * HP2, CE), jnp.float32)
    w_ep = w_ep.at[0:2 * H, 0:H].set(p["wrh"])                 # h_cat -> new_h
    w_ep = w_ep.at[HP2:HP2 + 2 * H, H:2 * H].set(p["wrc"])     # c_cat -> new_c
    w_ep = w_ep.at[0:2 * H, 2 * H:2 * H + O].set(whl_f)        # h_cat -> labels
    b_ep = jnp.zeros((1, CE), jnp.float32)
    b_ep = b_ep.at[:, 0:H].set(p["brh"])
    b_ep = b_ep.at[:, H:2 * H].set(p["brc"])
    b_ep = b_ep.at[:, 2 * H:2 * H + O].set(bhl_f)

    return {"w_in": w_in, "b_in": b_in, "w_hh": w_hh, "w_ep": w_ep, "b_ep": b_ep}


# ----------------------------------------------------------------------------
# Deterministic parameter init (shapes follow the nn.Module __init__)
# ----------------------------------------------------------------------------
def _xavier(key, out_f, in_f):
    bound = (6.0 / (in_f + out_f)) ** 0.5
    return jax.random.uniform(key, (out_f, in_f), jnp.float32, -bound, bound)


def _kaiming_linear(key, out_f, in_f):
    kw, kb = jax.random.split(key)
    bound = 1.0 / (in_f ** 0.5)
    w = jax.random.uniform(kw, (out_f, in_f), jnp.float32, -bound, bound)
    b = jax.random.uniform(kb, (out_f,), jnp.float32, -bound, bound)
    return w, b


def init_params(key, z_dim, hidden_size, output_size):
    ks = jax.random.split(key, 8)
    H, D, O = hidden_size, z_dim, output_size

    # LSTM weights: xavier_uniform, biases zero (as in init_weight())
    wih_f = _xavier(ks[0], 4 * H, D)          # weight_ih_l0         (4H, D)
    whh_f = _xavier(ks[1], 4 * H, H)          # weight_hh_l0         (4H, H)
    wih_b = _xavier(ks[2], 4 * H, D)          # weight_ih_l0_reverse
    whh_b = _xavier(ks[3], 4 * H, H)          # weight_hh_l0_reverse

    # reduce_h_W / reduce_c_W : default nn.Linear init
    wrh, brh = _kaiming_linear(ks[4], H, 2 * H)
    wrc, brc = _kaiming_linear(ks[5], H, 2 * H)

    # hiddenToLabel: xavier weight, default bias
    whl = _xavier(ks[6], O, H)
    bhl = jax.random.uniform(ks[7], (O,), jnp.float32,
                             -1.0 / (H ** 0.5), 1.0 / (H ** 0.5))

    # store everything in kernel layout: (in_features, out_features), 2D biases
    return {
        "wih_f": wih_f.T, "whh_f": whh_f.T, "b_f": jnp.zeros((1, 4 * H), jnp.float32),
        "wih_b": wih_b.T, "whh_b": whh_b.T, "b_b": jnp.zeros((1, 4 * H), jnp.float32),
        "wrh": wrh.T, "brh": brh[None, :],
        "wrc": wrc.T, "brc": brc[None, :],
        "whl": whl.T, "bhl": bhl[None, :],
    }


# ----------------------------------------------------------------------------
# Pure-JAX reference using the UNFUSED params (independent correctness check)
# ----------------------------------------------------------------------------
def decoder_reference(z, p):
    B, T, D = z.shape
    H = p["whh_f"].shape[0]

    def step(x_t, h, c, wih, whh, b):
        g = x_t @ wih + h @ whh + b
        i = jax.nn.sigmoid(g[:, 0 * H:1 * H])
        f = jax.nn.sigmoid(g[:, 1 * H:2 * H])
        gg = jnp.tanh(g[:, 2 * H:3 * H])
        o = jax.nn.sigmoid(g[:, 3 * H:4 * H])
        c2 = f * c + i * gg
        return o * jnp.tanh(c2), c2

    h_f = c_f = h_b = c_b = jnp.zeros((B, H), jnp.float32)
    for t in range(T):
        h_f, c_f = step(z[:, t, :], h_f, c_f, p["wih_f"], p["whh_f"], p["b_f"])
        h_b, c_b = step(z[:, T - 1 - t, :], h_b, c_b, p["wih_b"], p["whh_b"], p["b_b"])
    h_cat = jnp.concatenate([h_f, h_b], axis=1)
    c_cat = jnp.concatenate([c_f, c_b], axis=1)
    new_h = h_cat @ p["wrh"] + p["brh"]
    new_c = c_cat @ p["wrc"] + p["brc"]
    labels = new_h @ p["whl"] + p["bhl"]
    probs = jax.nn.log_softmax(labels[0], axis=0)
    return probs, (new_h, new_c)


if __name__ == "__main__":
    B, T, Z_DIM, HIDDEN, OUT = 2, 8, 4, 32, 16
    key = jax.random.PRNGKey(0)
    k_z, k_p = jax.random.split(key)

    z = jax.random.normal(k_z, (B, T, Z_DIM), jnp.float32)
    params = init_params(k_p, Z_DIM, HIDDEN, OUT)
    fused = fuse_params(params)

    probs, (new_h, new_c) = decoder_forward(z, fused, H=HIDDEN, O=OUT)
    jax.block_until_ready((probs, new_h, new_c))

    probs_ref, (h_ref, c_ref) = decoder_reference(z, params)
    assert probs.shape == (OUT,) and new_h.shape == (B, HIDDEN) and new_c.shape == (B, HIDDEN)
    # Tolerance allows for the fused/folded matmul op-order differences under the
    # default TPU matmul precision; structural bugs would be orders of magnitude larger.
    assert jnp.allclose(probs, probs_ref, atol=5e-3, rtol=5e-3)
    assert jnp.allclose(new_h, h_ref, atol=5e-3, rtol=5e-3)
    assert jnp.allclose(new_c, c_ref, atol=5e-3, rtol=5e-3)

    print("KERNEL_OK")
</pallas_src>

<mosaic_0001>
module attributes {stable_mosaic.version = 11 : i64} {
  func.func @_decoder_kernel(%arg0: memref<64x8xf32, #tpu.memory_space<vmem>>, %arg1: memref<8x512xf32, #tpu.memory_space<vmem>>, %arg2: memref<1x512xf32, #tpu.memory_space<vmem>>, %arg3: memref<128x512xf32, #tpu.memory_space<vmem>>, %arg4: memref<256x128xf32, #tpu.memory_space<vmem>>, %arg5: memref<1x128xf32, #tpu.memory_space<vmem>>, %arg6: memref<8x128xf32, #tpu.memory_space<vmem>>) attributes {dimension_semantics = [], scalar_prefetch = 0 : i64, scratch_operands = 0 : i64, tpu.core_type = #tpu.core_type<tc>} {
    %c0 = arith.constant 0 : index
    %c0_0 = arith.constant 0 : index
    %0 = vector.load %arg0[%c0, %c0_0] : memref<64x8xf32, #tpu.memory_space<vmem>>, vector<64x8xf32>
    %c0_1 = arith.constant 0 : index
    %c0_2 = arith.constant 0 : index
    %1 = vector.load %arg1[%c0_1, %c0_2] : memref<8x512xf32, #tpu.memory_space<vmem>>, vector<8x512xf32>
    %cst = arith.constant dense<0.000000e+00> : vector<64x512xf32>
    %2 = tpu.matmul %0, %1, %cst {dimension_numbers = #tpu.dot_dimension_numbers<[1], [0], [0], [1], [0, 0, 1, 1], [], []>} : vector<64x8xf32>, vector<8x512xf32>, vector<64x512xf32> -> vector<64x512xf32>
    %c0_3 = arith.constant 0 : index
    %c0_4 = arith.constant 0 : index
    %3 = vector.load %arg2[%c0_3, %c0_4] : memref<1x512xf32, #tpu.memory_space<vmem>>, vector<1x512xf32>
    %4 = vector.broadcast %3 : vector<1x512xf32> to vector<64x512xf32>
    %5 = arith.addf %2, %4 : vector<64x512xf32>
    %c0_5 = arith.constant 0 : index
    %c0_6 = arith.constant 0 : index
    %6 = vector.load %arg3[%c0_5, %c0_6] : memref<128x512xf32, #tpu.memory_space<vmem>>, vector<128x512xf32>
    %cst_7 = arith.constant 0.000000e+00 : f32
    %7 = vector.broadcast %cst_7 : f32 to vector<8x128xf32>
    %cst_8 = arith.constant 0.000000e+00 : f32
    %8 = vector.broadcast %cst_8 : f32 to vector<8x128xf32>
    %9 = vector.extract_strided_slice %5 {offsets = [0, 0], sizes = [8, 512], strides = [1, 1]} : vector<64x512xf32> to vector<8x512xf32>
    %cst_9 = arith.constant dense<0.000000e+00> : vector<8x512xf32>
    %10 = tpu.matmul %7, %6, %cst_9 {dimension_numbers = #tpu.dot_dimension_numbers<[1], [0], [0], [1], [0, 0, 1, 1], [], []>} : vector<8x128xf32>, vector<128x512xf32>, vector<8x512xf32> -> vector<8x512xf32>
    %11 = arith.addf %9, %10 : vector<8x512xf32>
    %12 = vector.extract_strided_slice %11 {offsets = [0, 0], sizes = [8, 384], strides = [1, 1]} : vector<8x512xf32> to vector<8x384xf32>
    %13 = arith.negf %12 : vector<8x384xf32>
    %14 = math.exp %13 : vector<8x384xf32>
    %cst_10 = arith.constant 1.000000e+00 : f32
    %15 = vector.broadcast %cst_10 : f32 to vector<8x384xf32>
    %16 = arith.addf %15, %14 : vector<8x384xf32>
    %17 = arith.divf %15, %16 : vector<8x384xf32>
    %18 = vector.extract_strided_slice %17 {offsets = [0, 0], sizes = [8, 128], strides = [1, 1]} : vector<8x384xf32> to vector<8x128xf32>
    %19 = vector.extract_strided_slice %17 {offsets = [0, 128], sizes = [8, 128], strides = [1, 1]} : vector<8x384xf32> to vector<8x128xf32>
    %20 = vector.extract_strided_slice %17 {offsets = [0, 256], sizes = [8, 128], strides = [1, 1]} : vector<8x384xf32> to vector<8x128xf32>
    %21 = vector.extract_strided_slice %11 {offsets = [0, 384], sizes = [8, 128], strides = [1, 1]} : vector<8x512xf32> to vector<8x128xf32>
    %22 = math.tanh %21 : vector<8x128xf32>
    %23 = arith.mulf %19, %8 : vector<8x128xf32>
    %24 = arith.mulf %18, %22 : vector<8x128xf32>
    %25 = arith.addf %23, %24 : vector<8x128xf32>
    %26 = math.tanh %25 : vector<8x128xf32>
    %27 = arith.mulf %20, %26 : vector<8x128xf32>
    %28 = vector.extract_strided_slice %5 {offsets = [8, 0], sizes = [8, 512], strides = [1, 1]} : vector<64x512xf32> to vector<8x512xf32>
    %cst_11 = arith.constant dense<0.000000e+00> : vector<8x512xf32>
    %29 = tpu.matmul %27, %6, %cst_11 {dimension_numbers = #tpu.dot_dimension_numbers<[1], [0], [0], [1], [0, 0, 1, 1], [], []>} : vector<8x128xf32>, vector<128x512xf32>, vector<8x512xf32> -> vector<8x512xf32>
    %30 = arith.addf %28, %29 : vector<8x512xf32>
    %31 = vector.extract_strided_slice %30 {offsets = [0, 0], sizes = [8, 384], strides = [1, 1]} : vector<8x512xf32> to vector<8x384xf32>
    %32 = arith.negf %31 : vector<8x384xf32>
    %33 = math.exp %32 : vector<8x384xf32>
    %cst_12 = arith.constant 1.000000e+00 : f32
    %34 = vector.broadcast %cst_12 : f32 to vector<8x384xf32>
    %35 = arith.addf %34, %33 : vector<8x384xf32>
    %36 = arith.divf %34, %35 : vector<8x384xf32>
    %37 = vector.extract_strided_slice %36 {offsets = [0, 0], sizes = [8, 128], strides = [1, 1]} : vector<8x384xf32> to vector<8x128xf32>
    %38 = vector.extract_strided_slice %36 {offsets = [0, 128], sizes = [8, 128], strides = [1, 1]} : vector<8x384xf32> to vector<8x128xf32>
    %39 = vector.extract_strided_slice %36 {offsets = [0, 256], sizes = [8, 128], strides = [1, 1]} : vector<8x384xf32> to vector<8x128xf32>
    %40 = vector.extract_strided_slice %30 {offsets = [0, 384], sizes = [8, 128], strides = [1, 1]} : vector<8x512xf32> to vector<8x128xf32>
    %41 = math.tanh %40 : vector<8x128xf32>
    %42 = arith.mulf %38, %25 : vector<8x128xf32>
    %43 = arith.mulf %37, %41 : vector<8x128xf32>
    %44 = arith.addf %42, %43 : vector<8x128xf32>
    %45 = math.tanh %44 : vector<8x128xf32>
    %46 = arith.mulf %39, %45 : vector<8x128xf32>
    %47 = vector.extract_strided_slice %5 {offsets = [16, 0], sizes = [8, 512], strides = [1, 1]} : vector<64x512xf32> to vector<8x512xf32>
    %cst_13 = arith.constant dense<0.000000e+00> : vector<8x512xf32>
    %48 = tpu.matmul %46, %6, %cst_13 {dimension_numbers = #tpu.dot_dimension_numbers<[1], [0], [0], [1], [0, 0, 1, 1], [], []>} : vector<8x128xf32>, vector<128x512xf32>, vector<8x512xf32> -> vector<8x512xf32>
    %49 = arith.addf %47, %48 : vector<8x512xf32>
    %50 = vector.extract_strided_slice %49 {offsets = [0, 0], sizes = [8, 384], strides = [1, 1]} : vector<8x512xf32> to vector<8x384xf32>
    %51 = arith.negf %50 : vector<8x384xf32>
    %52 = math.exp %51 : vector<8x384xf32>
    %cst_14 = arith.constant 1.000000e+00 : f32
    %53 = vector.broadcast %cst_14 : f32 to vector<8x384xf32>
    %54 = arith.addf %53, %52 : vector<8x384xf32>
    %55 = arith.divf %53, %54 : vector<8x384xf32>
    %56 = vector.extract_strided_slice %55 {offsets = [0, 0], sizes = [8, 128], strides = [1, 1]} : vector<8x384xf32> to vector<8x128xf32>
    %57 = vector.extract_strided_slice %55 {offsets = [0, 128], sizes = [8, 128], strides = [1, 1]} : vector<8x384xf32> to vector<8x128xf32>
    %58 = vector.extract_strided_slice %55 {offsets = [0, 256], sizes = [8, 128], strides = [1, 1]} : vector<8x384xf32> to vector<8x128xf32>
    %59 = vector.extract_strided_slice %49 {offsets = [0, 384], sizes = [8, 128], strides = [1, 1]} : vector<8x512xf32> to vector<8x128xf32>
    %60 = math.tanh %59 : vector<8x128xf32>
    %61 = arith.mulf %57, %44 : vector<8x128xf32>
    %62 = arith.mulf %56, %60 : vector<8x128xf32>
    %63 = arith.addf %61, %62 : vector<8x128xf32>
    %64 = math.tanh %63 : vector<8x128xf32>
    %65 = arith.mulf %58, %64 : vector<8x128xf32>
    %66 = vector.extract_strided_slice %5 {offsets = [24, 0], sizes = [8, 512], strides = [1, 1]} : vector<64x512xf32> to vector<8x512xf32>
    %cst_15 = arith.constant dense<0.000000e+00> : vector<8x512xf32>
    %67 = tpu.matmul %65, %6, %cst_15 {dimension_numbers = #tpu.dot_dimension_numbers<[1], [0], [0], [1], [0, 0, 1, 1], [], []>} : vector<8x128xf32>, vector<128x512xf32>, vector<8x512xf32> -> vector<8x512xf32>
    %68 = arith.addf %66, %67 : vector<8x512xf32>
    %69 = vector.extract_strided_slice %68 {offsets = [0, 0], sizes = [8, 384], strides = [1, 1]} : vector<8x512xf32> to vector<8x384xf32>
    %70 = arith.negf %69 : vector<8x384xf32>
    %71 = math.exp %70 : vector<8x384xf32>
    %cst_16 = arith.constant 1.000000e+00 : f32
    %72 = vector.broadcast %cst_16 : f32 to vector<8x384xf32>
    %73 = arith.addf %72, %71 : vector<8x384xf32>
    %74 = arith.divf %72, %73 : vector<8x384xf32>
    %75 = vector.extract_strided_slice %74 {offsets = [0, 0], sizes = [8, 128], strides = [1, 1]} : vector<8x384xf32> to vector<8x128xf32>
    %76 = vector.extract_strided_slice %74 {offsets = [0, 128], sizes = [8, 128], strides = [1, 1]} : vector<8x384xf32> to vector<8x128xf32>
    %77 = vector.extract_strided_slice %74 {offsets = [0, 256], sizes = [8, 128], strides = [1, 1]} : vector<8x384xf32> to vector<8x128xf32>
    %78 = vector.extract_strided_slice %68 {offsets = [0, 384], sizes = [8, 128], strides = [1, 1]} : vector<8x512xf32> to vector<8x128xf32>
    %79 = math.tanh %78 : vector<8x128xf32>
    %80 = arith.mulf %76, %63 : vector<8x128xf32>
    %81 = arith.mulf %75, %79 : vector<8x128xf32>
    %82 = arith.addf %80, %81 : vector<8x128xf32>
    %83 = math.tanh %82 : vector<8x128xf32>
    %84 = arith.mulf %77, %83 : vector<8x128xf32>
    %85 = vector.extract_strided_slice %5 {offsets = [32, 0], sizes = [8, 512], strides = [1, 1]} : vector<64x512xf32> to vector<8x512xf32>
    %cst_17 = arith.constant dense<0.000000e+00> : vector<8x512xf32>
    %86 = tpu.matmul %84, %6, %cst_17 {dimension_numbers = #tpu.dot_dimension_numbers<[1], [0], [0], [1], [0, 0, 1, 1], [], []>} : vector<8x128xf32>, vector<128x512xf32>, vector<8x512xf32> -> vector<8x512xf32>
    %87 = arith.addf %85, %86 : vector<8x512xf32>
    %88 = vector.extract_strided_slice %87 {offsets = [0, 0], sizes = [8, 384], strides = [1, 1]} : vector<8x512xf32> to vector<8x384xf32>
    %89 = arith.negf %88 : vector<8x384xf32>
    %90 = math.exp %89 : vector<8x384xf32>
    %cst_18 = arith.constant 1.000000e+00 : f32
    %91 = vector.broadcast %cst_18 : f32 to vector<8x384xf32>
    %92 = arith.addf %91, %90 : vector<8x384xf32>
    %93 = arith.divf %91, %92 : vector<8x384xf32>
    %94 = vector.extract_strided_slice %93 {offsets = [0, 0], sizes = [8, 128], strides = [1, 1]} : vector<8x384xf32> to vector<8x128xf32>
    %95 = vector.extract_strided_slice %93 {offsets = [0, 128], sizes = [8, 128], strides = [1, 1]} : vector<8x384xf32> to vector<8x128xf32>
    %96 = vector.extract_strided_slice %93 {offsets = [0, 256], sizes = [8, 128], strides = [1, 1]} : vector<8x384xf32> to vector<8x128xf32>
    %97 = vector.extract_strided_slice %87 {offsets = [0, 384], sizes = [8, 128], strides = [1, 1]} : vector<8x512xf32> to vector<8x128xf32>
    %98 = math.tanh %97 : vector<8x128xf32>
    %99 = arith.mulf %95, %82 : vector<8x128xf32>
    %100 = arith.mulf %94, %98 : vector<8x128xf32>
    %101 = arith.addf %99, %100 : vector<8x128xf32>
    %102 = math.tanh %101 : vector<8x128xf32>
    %103 = arith.mulf %96, %102 : vector<8x128xf32>
    %104 = vector.extract_strided_slice %5 {offsets = [40, 0], sizes = [8, 512], strides = [1, 1]} : vector<64x512xf32> to vector<8x512xf32>
    %cst_19 = arith.constant dense<0.000000e+00> : vector<8x512xf32>
    %105 = tpu.matmul %103, %6, %cst_19 {dimension_numbers = #tpu.dot_dimension_numbers<[1], [0], [0], [1], [0, 0, 1, 1], [], []>} : vector<8x128xf32>, vector<128x512xf32>, vector<8x512xf32> -> vector<8x512xf32>
    %106 = arith.addf %104, %105 : vector<8x512xf32>
    %107 = vector.extract_strided_slice %106 {offsets = [0, 0], sizes = [8, 384], strides = [1, 1]} : vector<8x512xf32> to vector<8x384xf32>
    %108 = arith.negf %107 : vector<8x384xf32>
    %109 = math.exp %108 : vector<8x384xf32>
    %cst_20 = arith.constant 1.000000e+00 : f32
    %110 = vector.broadcast %cst_20 : f32 to vector<8x384xf32>
    %111 = arith.addf %110, %109 : vector<8x384xf32>
    %112 = arith.divf %110, %111 : vector<8x384xf32>
    %113 = vector.extract_strided_slice %112 {offsets = [0, 0], sizes = [8, 128], strides = [1, 1]} : vector<8x384xf32> to vector<8x128xf32>
    %114 = vector.extract_strided_slice %112 {offsets = [0, 128], sizes = [8, 128], strides = [1, 1]} : vector<8x384xf32> to vector<8x128xf32>
    %115 = vector.extract_strided_slice %112 {offsets = [0, 256], sizes = [8, 128], strides = [1, 1]} : vector<8x384xf32> to vector<8x128xf32>
    %116 = vector.extract_strided_slice %106 {offsets = [0, 384], sizes = [8, 128], strides = [1, 1]} : vector<8x512xf32> to vector<8x128xf32>
    %117 = math.tanh %116 : vector<8x128xf32>
    %118 = arith.mulf %114, %101 : vector<8x128xf32>
    %119 = arith.mulf %113, %117 : vector<8x128xf32>
    %120 = arith.addf %118, %119 : vector<8x128xf32>
    %121 = math.tanh %120 : vector<8x128xf32>
    %122 = arith.mulf %115, %121 : vector<8x128xf32>
    %123 = vector.extract_strided_slice %5 {offsets = [48, 0], sizes = [8, 512], strides = [1, 1]} : vector<64x512xf32> to vector<8x512xf32>
    %cst_21 = arith.constant dense<0.000000e+00> : vector<8x512xf32>
    %124 = tpu.matmul %122, %6, %cst_21 {dimension_numbers = #tpu.dot_dimension_numbers<[1], [0], [0], [1], [0, 0, 1, 1], [], []>} : vector<8x128xf32>, vector<128x512xf32>, vector<8x512xf32> -> vector<8x512xf32>
    %125 = arith.addf %123, %124 : vector<8x512xf32>
    %126 = vector.extract_strided_slice %125 {offsets = [0, 0], sizes = [8, 384], strides = [1, 1]} : vector<8x512xf32> to vector<8x384xf32>
    %127 = arith.negf %126 : vector<8x384xf32>
    %128 = math.exp %127 : vector<8x384xf32>
    %cst_22 = arith.constant 1.000000e+00 : f32
    %129 = vector.broadcast %cst_22 : f32 to vector<8x384xf32>
    %130 = arith.addf %129, %128 : vector<8x384xf32>
    %131 = arith.divf %129, %130 : vector<8x384xf32>
    %132 = vector.extract_strided_slice %131 {offsets = [0, 0], sizes = [8, 128], strides = [1, 1]} : vector<8x384xf32> to vector<8x128xf32>
    %133 = vector.extract_strided_slice %131 {offsets = [0, 128], sizes = [8, 128], strides = [1, 1]} : vector<8x384xf32> to vector<8x128xf32>
    %134 = vector.extract_strided_slice %131 {offsets = [0, 256], sizes = [8, 128], strides = [1, 1]} : vector<8x384xf32> to vector<8x128xf32>
    %135 = vector.extract_strided_slice %125 {offsets = [0, 384], sizes = [8, 128], strides = [1, 1]} : vector<8x512xf32> to vector<8x128xf32>
    %136 = math.tanh %135 : vector<8x128xf32>
    %137 = arith.mulf %133, %120 : vector<8x128xf32>
    %138 = arith.mulf %132, %136 : vector<8x128xf32>
    %139 = arith.addf %137, %138 : vector<8x128xf32>
    %140 = math.tanh %139 : vector<8x128xf32>
    %141 = arith.mulf %134, %140 : vector<8x128xf32>
    %142 = vector.extract_strided_slice %5 {offsets = [56, 0], sizes = [8, 512], strides = [1, 1]} : vector<64x512xf32> to vector<8x512xf32>
    %cst_23 = arith.constant dense<0.000000e+00> : vector<8x512xf32>
    %143 = tpu.matmul %141, %6, %cst_23 {dimension_numbers = #tpu.dot_dimension_numbers<[1], [0], [0], [1], [0, 0, 1, 1], [], []>} : vector<8x128xf32>, vector<128x512xf32>, vector<8x512xf32> -> vector<8x512xf32>
    %144 = arith.addf %142, %143 : vector<8x512xf32>
    %145 = vector.extract_strided_slice %144 {offsets = [0, 0], sizes = [8, 384], strides = [1, 1]} : vector<8x512xf32> to vector<8x384xf32>
    %146 = arith.negf %145 : vector<8x384xf32>
    %147 = math.exp %146 : vector<8x384xf32>
    %cst_24 = arith.constant 1.000000e+00 : f32
    %148 = vector.broadcast %cst_24 : f32 to vector<8x384xf32>
    %149 = arith.addf %148, %147 : vector<8x384xf32>
    %150 = arith.divf %148, %149 : vector<8x384xf32>
    %151 = vector.extract_strided_slice %150 {offsets = [0, 0], sizes = [8, 128], strides = [1, 1]} : vector<8x384xf32> to vector<8x128xf32>
    %152 = vector.extract_strided_slice %150 {offsets = [0, 128], sizes = [8, 128], strides = [1, 1]} : vector<8x384xf32> to vector<8x128xf32>
    %153 = vector.extract_strided_slice %150 {offsets = [0, 256], sizes = [8, 128], strides = [1, 1]} : vector<8x384xf32> to vector<8x128xf32>
    %154 = vector.extract_strided_slice %144 {offsets = [0, 384], sizes = [8, 128], strides = [1, 1]} : vector<8x512xf32> to vector<8x128xf32>
    %155 = math.tanh %154 : vector<8x128xf32>
    %156 = arith.mulf %152, %139 : vector<8x128xf32>
    %157 = arith.mulf %151, %155 : vector<8x128xf32>
    %158 = arith.addf %156, %157 : vector<8x128xf32>
    %159 = math.tanh %158 : vector<8x128xf32>
    %160 = arith.mulf %153, %159 : vector<8x128xf32>
    %161 = tpu.concatenate %160, %158 in 1 : vector<8x128xf32>, vector<8x128xf32> -> vector<8x256xf32>
    %c0_25 = arith.constant 0 : index
    %c0_26 = arith.constant 0 : index
    %162 = vector.load %arg4[%c0_25, %c0_26] : memref<256x128xf32, #tpu.memory_space<vmem>>, vector<256x128xf32>
    %cst_27 = arith.constant dense<0.000000e+00> : vector<8x128xf32>
    %163 = tpu.matmul %161, %162, %cst_27 {dimension_numbers = #tpu.dot_dimension_numbers<[1], [0], [0], [1], [0, 0, 1, 1], [], []>} : vector<8x256xf32>, vector<256x128xf32>, vector<8x128xf32> -> vector<8x128xf32>
    %c0_28 = arith.constant 0 : index
    %c0_29 = arith.constant 0 : index
    %164 = vector.load %arg5[%c0_28, %c0_29] : memref<1x128xf32, #tpu.memory_space<vmem>>, vector<1x128xf32>
    %165 = vector.broadcast %164 : vector<1x128xf32> to vector<8x128xf32>
    %166 = arith.addf %163, %165 : vector<8x128xf32>
    %167 = vector.extract_strided_slice %166 {offsets = [0, 64], sizes = [1, 16], strides = [1, 1]} : vector<8x128xf32> to vector<1x16xf32>
    %cst_30 = arith.constant dense<0xFF800000> : vector<1xf32>
    %168 = vector.multi_reduction <maximumf>, %167, %cst_30 [1] : vector<1x16xf32> to vector<1xf32>
    %169 = vector.shape_cast %168 : vector<1xf32> to vector<1x1xf32>
    %170 = vector.broadcast %169 : vector<1x1xf32> to vector<1x16xf32>
    %171 = arith.subf %167, %170 : vector<1x16xf32>
    %172 = math.exp %171 : vector<1x16xf32>
    %cst_31 = arith.constant dense<0.000000e+00> : vector<1xf32>
    %173 = vector.multi_reduction <add>, %172, %cst_31 [1] : vector<1x16xf32> to vector<1xf32>
    %174 = vector.shape_cast %173 : vector<1xf32> to vector<1x1xf32>
    %175 = math.log %174 : vector<1x1xf32>
    %176 = arith.addf %169, %175 : vector<1x1xf32>
    %177 = vector.broadcast %176 : vector<1x1xf32> to vector<1x16xf32>
    %178 = arith.subf %167, %177 : vector<1x16xf32>
    %c0_32 = arith.constant 0 : index
    %c0_33 = arith.constant 0 : index
    %179 = vector.load %arg6[%c0_32, %c0_33] : memref<8x128xf32, #tpu.memory_space<vmem>>, vector<8x128xf32>
    tpu.vector_store %arg6[%c0_32, %c0_33], %166 {strides = array<i32>} : memref<8x128xf32, #tpu.memory_space<vmem>>, vector<8x128xf32>,
    %c2 = arith.constant 2 : index
    %c0_34 = arith.constant 0 : index
    %180 = vector.load %arg6[%c2, %c0_34] : memref<8x128xf32, #tpu.memory_space<vmem>>, vector<1x16xf32>
    tpu.vector_store %arg6[%c2, %c0_34], %178 {strides = array<i32>} : memref<8x128xf32, #tpu.memory_space<vmem>>, vector<1x16xf32>,
    return
  }
}

</mosaic_0001>

<bundles_post_ra>
// kernel: decoder_forward.1
= control target key start
LH: loop header
LB: loop body
LE: loop exit
PB: predicated region body
PF: predicated region fallthrough
CT: control target
= control target key end

     0   :  { %11 = vsyncpa [#allocation3], 0  ;;  %s3325_s0 = inlined_call_operand.vmem [shape: f32[64,8], index: 0, kind: input, shape index: {}]   ;;  %s3326_s1 = inlined_call_operand.vmem [shape: f32[8,512], index: 1, kind: input, shape index: {}]   ;;  %s3327_s2 = inlined_call_operand.vmem [shape: f32[1,512], index: 2, kind: input, shape index: {}]   ;;  %s3328_s3 = inlined_call_operand.hbm [shape: f32[128,512], index: 3, kind: input, shape index: {}]   ;;  %s3329_s4 = inlined_call_operand.hbm [shape: f32[256,128], index: 4, kind: input, shape index: {}]   ;;  %s3330_s5 = inlined_call_operand.vmem [shape: f32[1,128], index: 5, kind: input, shape index: {}]   ;;  %s3331_s6 = inlined_call_operand.vmem [shape: f32[8,128], index: 6, kind: output, shape index: {}]  }
   0x1   :  { %12 = vsyncpa [#allocation5], 0  ;;  %s2772_s21 = smov [#allocation2]   ;;  %s2724_s25 = scalar_lea.hbm %s3328_s3, 8192 }
   0x2   :  { %s24_s22 = sshll.u32 %s2772_s21, 4  ;;  %p2725_p0 = scmp.ne.s32.totalorder %s3328_s3, %s2724_s25  ;;  %s25_s22 = int_to_ptr.vmem [resolvable:$true] %s24_s22 }
   0x3   :  { %p2728_p1 = scmp.lt.u32.totalorder %s2724_s25, %s3328_s3 }
   0x5   :  { %p2730_p2 = pnand %p2728_p1, %p2725_p0 }
   0x7   :  { %2733 = shalt.err (!%p2730_p2)
}
   0x8   :  { %s2734_s30 = scalar_lea.vmem %s25_s22, 8192  ;;  %p2739_p4 = scmp.lt.s32.totalorder %s25_s22, %s25_s22 }
   0x9   :  { %p2735_p3 = scmp.ne.s32.totalorder %s25_s22, %s2734_s30  ;;  %p2740_p5 = scmp.lt.s32.totalorder %s2734_s30, %s2734_s30 }
   0xb   :  { %p2741_p6 = por %p2740_p5, %p2739_p4 }
   0xd   :  { %p2742_p7 = pnand %p2741_p6, %p2735_p3 }
   0xf   :  { %2745 = shalt.err (!%p2742_p7)
}
  0x10   :  { %s2773_s7 = smov 512   ;;  %s2774_s8 = smov 32  }
  0x11   :  { %30 = dma.hbm_to_vmem [thread:$0]  %s3328_s3, 8192, %s25_s22, [#allocation3], %s2773_s7, %s2773_s7, %s2774_s8  }
  0x12   :  { %s2775_s11 = smov [#allocation4]   ;;  %s2746_s15 = scalar_lea.hbm %s3329_s4, 4096 }
  0x13   :  { %s36_s12 = sshll.u32 %s2775_s11, 4  ;;  %p2747_p8 = scmp.ne.s32.totalorder %s3329_s4, %s2746_s15  ;;  %s37_s12 = int_to_ptr.vmem [resolvable:$true] %s36_s12 }
  0x14   :  { %p2750_p9 = scmp.lt.u32.totalorder %s2746_s15, %s3329_s4 }
  0x16   :  { %p2752_p10 = pnand %p2750_p9, %p2747_p8 }
  0x18   :  { %2755 = shalt.err (!%p2752_p10)
}
  0x19   :  { %s2756_s20 = scalar_lea.vmem %s37_s12, 4096  ;;  %p2761_p12 = scmp.lt.s32.totalorder %s37_s12, %s37_s12 }
  0x1a   :  { %p2757_p11 = scmp.ne.s32.totalorder %s37_s12, %s2756_s20  ;;  %p2762_p13 = scmp.lt.s32.totalorder %s2756_s20, %s2756_s20 }
  0x1c   :  { %p2763_p0 = por %p2762_p13, %p2761_p12 }
  0x1e   :  { %p2764_p1 = pnand %p2763_p0, %p2757_p11 }
  0x20   :  { %2767 = shalt.err (!%p2764_p1)
}
  0x21   :  { %s2776_s3 = smov 128   ;;  %s2777_s21 = smov 8  }
  0x22   :  { %42 = dma.hbm_to_vmem [thread:$0]  %s3329_s4, 4096, %s37_s12, [#allocation5], %s2776_s3, %s2776_s3, %s2777_s21  }
  0x23   :  { %2768 = dma.done.wait [#allocation3], 8192  }
  0x24   :  { %2769 = vsyncadd [#allocation3], 4294959104 }
  0x25   :  { %2770 = dma.done.wait [#allocation5], 4096  }
  0x26   :  { %2771 = vsyncadd [#allocation5], 4294963200  ;;  %v2778_v0 = vmov 0.0   ;;  %v60_v1 = vld [vmem:[%s3326_s1 + $0x8] sm:$0xff]  ;;  %v62_v2 = vld [vmem:[%s3326_s1 + $0x18] sm:$0xff]  ;;  %vm85_vm0 = vcmask 64512  }
  0x27   :  { %174 = vmatprep.mubr.f32.mxu0 %v2778_v0  ;;  %287 = vmatprep.mubr.f32.mxu1 %v2778_v0  ;;  %v59_v3 = vld [vmem:[%s3326_s1] sm:$0xff]  ;;  %v61_v4 = vld [vmem:[%s3326_s1 + $0x10] sm:$0xff]  ;;  %v337_v6 = vld [vmem:[#allocation2 + $0x8] sm:$0xff]  ;;  %vm1869_vm1 = vcmask 647680   ;;  %s2779_s25 = smov 64   ;;  %vm1880_vm2 = vcmask 122880  }
  0x28   :  { %110 = vmatprep.subr.mxu0 %v60_v1  ;;  %223 = vmatprep.subr.mxu1 %v62_v2  ;;  %v51_v5 = vld [vmem:[%s3325_s0] sm:$0xff]  ;;  %v341_v7 = vld [vmem:[#allocation2 + $0x28] sm:$0xff]  ;;  %v339_v8 = vld [vmem:[#allocation2 + $0x18] sm:$0xff] }
  0x29   :  { %111 = vmatpush1.msra.mxu0 %v59_v3  ;;  %224 = vmatpush1.msra.mxu1 %v61_v4  ;;  %v343_v9 = vld [vmem:[#allocation2 + $0x38] sm:$0xff]  ;;  %v2858_v10 = vpack.c.bf16 %v341_v7, %v337_v6  ;;  %v336_v12 = vld [vmem:[#allocation2] sm:$0xff]  ;;  %v338_v14 = vld [vmem:[#allocation2 + $0x10] sm:$0xff] }
  0x2a   :  { %1900 = vmatmul.mubr.msk.f32.vlgmr.msra.gmra.mrb[0].mxu0 %vm85_vm0, %v51_v5  ;;  %1908 = vmatmul.mubr.msk.f32.vlgmr.msra.gmra.mrb[0].mxu1 %vm85_vm0, %v51_v5  ;;  %v2860_v11 = vpack.c.bf16 %v343_v9, %v339_v8  ;;  %v340_v13 = vld [vmem:[#allocation2 + $0x20] sm:$0xff]  ;;  %v342_v16 = vld [vmem:[#allocation2 + $0x30] sm:$0xff]  ;;  %v52_v17 = vld [vmem:[%s3325_s0 + $0x8] sm:$0xff] }
  0x2b   :  { %v2862_v15 = vpack.c.bf16 %v340_v13, %v336_v12  ;;  %180 = vmatprep.mubr.f32.mxu0 %v2778_v0  ;;  %293 = vmatprep.mubr.f32.mxu1 %v2778_v0  ;;  %v345_v18 = vld [vmem:[#allocation2 + $0x48] sm:$0xff]  ;;  %v2871_v19 = vpack.c.bf16 %v342_v16, %v338_v14  ;;  %v347_v21 = vld [vmem:[#allocation2 + $0x58] sm:$0xff]  ;;  %v344_v25 = vld [vmem:[#allocation2 + $0x40] sm:$0xff] }
  0x2c   :  { %1977 = vmatprep.subr.bf16.mxu0 %v2858_v10  ;;  %2009 = vmatprep.subr.bf16.mxu1 %v2860_v11  ;;  %v349_v20 = vld [vmem:[#allocation2 + $0x68] sm:$0xff]  ;;  %v351_v22 = vld [vmem:[#allocation2 + $0x78] sm:$0xff]  ;;  %v348_v26 = vld [vmem:[#allocation2 + $0x60] sm:$0xff] }
  0x2d   :  { %1979 = vmatpush1.bf16.msra.mxu0 %v2862_v15  ;;  %v2874_v23 = vpack.c.bf16 %v349_v20, %v345_v18  ;;  %v2876_v24 = vpack.c.bf16 %v351_v22, %v347_v21  ;;  %v346_v27 = vld [vmem:[#allocation2 + $0x50] sm:$0xff]  ;;  %2011 = vmatpush1.bf16.msra.mxu1 %v2871_v19  ;;  %v2880_v28 = vpack.c.bf16 %v348_v26, %v344_v25  ;;  %v353_v31 = vld [vmem:[#allocation2 + $0x88] sm:$0xff]  ;;  %v355_v34 = vld [vmem:[#allocation2 + $0x98] sm:$0xff] }
  0x2e   :  { %1901 = vmatmul.mubr.msk.f32.gmra.mrb[2].mxu0 %vm85_vm0, %v52_v17  ;;  %v350_v29 = vld [vmem:[#allocation2 + $0x70] sm:$0xff]  ;;  %1909 = vmatmul.mubr.msk.f32.gmra.mrb[2].mxu1 %vm85_vm0, %v52_v17  ;;  %v357_v33 = vld [vmem:[#allocation2 + $0xa8] sm:$0xff]  ;;  %v359_v35 = vld [vmem:[#allocation2 + $0xb8] sm:$0xff] }
  0x2f   :  { %v53_v30 = vld [vmem:[%s3325_s0 + $0x10] sm:$0xff]  ;;  %1981 = vmatprep.subr.bf16.mxu0 %v2874_v23  ;;  %v2887_v32 = vpack.c.bf16 %v350_v29, %v346_v27  ;;  %2013 = vmatprep.subr.bf16.mxu1 %v2876_v24  ;;  %v2891_v36 = vpack.c.bf16 %v357_v33, %v353_v31  ;;  %v2893_v37 = vpack.c.bf16 %v359_v35, %v355_v34  ;;  %v352_v38 = vld [vmem:[#allocation2 + $0x80] sm:$0xff]  ;;  %v54_v43 = vld [vmem:[%s3325_s0 + $0x18] sm:$0xff] }
  0x30   :  { %186 = vmatprep.mubr.f32.mxu0 %v2778_v0  ;;  %v356_v39 = vld [vmem:[#allocation2 + $0xa0] sm:$0xff]  ;;  %v354_v40 = vld [vmem:[#allocation2 + $0x90] sm:$0xff]  ;;  %299 = vmatprep.mubr.f32.mxu1 %v2778_v0  ;;  %v361_v44 = vld [vmem:[#allocation2 + $0xc8] sm:$0xff] }
  0x31   :  { %1983 = vmatpush1.bf16.msra.mxu0 %v2880_v28  ;;  %v2897_v41 = vpack.c.bf16 %v356_v39, %v352_v38  ;;  %v358_v42 = vld [vmem:[#allocation2 + $0xb0] sm:$0xff]  ;;  %2015 = vmatpush1.bf16.msra.mxu1 %v2887_v32  ;;  %v365_v46 = vld [vmem:[#allocation2 + $0xe8] sm:$0xff]  ;;  %v363_v47 = vld [vmem:[#allocation2 + $0xd8] sm:$0xff] }
  0x32   :  { %1902 = vmatmul.mubr.msk.f32.gmra.mrb[4].mxu0 %vm85_vm0, %v53_v30  ;;  %v2904_v45 = vpack.c.bf16 %v358_v42, %v354_v40  ;;  %v367_v48 = vld [vmem:[#allocation2 + $0xf8] sm:$0xff]  ;;  %1910 = vmatmul.mubr.msk.f32.gmra.mrb[4].mxu1 %vm85_vm0, %v53_v30  ;;  %v2908_v49 = vpack.c.bf16 %v365_v46, %v361_v44  ;;  %v360_v50 = vld [vmem:[#allocation2 + $0xc0] sm:$0xff]  ;;  %v362_v52 = vld [vmem:[#allocation2 + $0xd0] sm:$0xff] }
  0x33   :  { %1985 = vmatprep.subr.bf16.mxu0 %v2891_v36  ;;  %v364_v51 = vld [vmem:[#allocation2 + $0xe0] sm:$0xff]  ;;  %2017 = vmatprep.subr.bf16.mxu1 %v2893_v37  ;;  %v2912_v53 = vpack.c.bf16 %v367_v48, %v363_v47  ;;  %v366_v54 = vld [vmem:[#allocation2 + $0xf0] sm:$0xff]  ;;  %v369_v55 = vld [vmem:[#allocation2 + $0x108] sm:$0xff] }
  0x34   :  { %192 = vmatprep.mubr.f32.mxu0 %v2778_v0  ;;  %305 = vmatprep.mubr.f32.mxu1 %v2778_v0  ;;  %v2916_v56 = vpack.c.bf16 %v364_v51, %v360_v50  ;;  %v373_v57 = vld [vmem:[#allocation2 + $0x128] sm:$0xff]  ;;  %v371_v58 = vld [vmem:[#allocation2 + $0x118] sm:$0xff]  ;;  %v2920_v60 = vpack.c.bf16 %v366_v54, %v362_v52  ;;  %v368_v61 = vld [vmem:[#allocation2 + $0x100] sm:$0xff] }
  0x35   :  { %1987 = vmatpush1.bf16.msra.mxu0 %v2897_v41  ;;  %v375_v59 = vld [vmem:[#allocation2 + $0x138] sm:$0xff]  ;;  %2019 = vmatpush1.bf16.msra.mxu1 %v2904_v45  ;;  %v372_v62 = vld [vmem:[#allocation2 + $0x120] sm:$0xff]  ;;  %v2927_v1 = vpack.c.bf16 %v373_v57, %v369_v55  ;;  %v370_v2 = vld [vmem:[#allocation2 + $0x110] sm:$0xff] }
  0x36   :  { %1903 = vmatmul.mubr.msk.f32.gmra.mrb[6].mxu0 %vm85_vm0, %v54_v43  ;;  %1911 = vmatmul.mubr.msk.f32.gmra.mrb[6].mxu1 %vm85_vm0, %v54_v43  ;;  %v55_v63 = vld [vmem:[%s3325_s0 + $0x20] sm:$0xff]  ;;  %v374_v3 = vld [vmem:[#allocation2 + $0x130] sm:$0xff]  ;;  %v2931_v4 = vpack.c.bf16 %v375_v59, %v371_v58  ;;  %v377_v5 = vld [vmem:[#allocation2 + $0x148] sm:$0xff]  ;;  %v2935_v7 = vpack.c.bf16 %v372_v62, %v368_v61  ;;  %v65_v62 = vlaneseq }
  0x37   :  { %1989 = vmatprep.subr.bf16.mxu0 %v2908_v49  ;;  %2021 = vmatprep.subr.bf16.mxu1 %v2912_v53  ;;  %v381_v6 = vld [vmem:[#allocation2 + $0x168] sm:$0xff]  ;;  %v379_v8 = vld [vmem:[#allocation2 + $0x158] sm:$0xff]  ;;  %v2939_v12 = vpack.c.bf16 %v374_v3, %v370_v2  ;;  %v376_v13 = vld [vmem:[#allocation2 + $0x140] sm:$0xff] }
  0x38   :  { %198 = vmatprep.mubr.f32.mxu0 %v2778_v0  ;;  %311 = vmatprep.mubr.f32.mxu1 %v2778_v0  ;;  %v383_v9 = vld [vmem:[#allocation2 + $0x178] sm:$0xff]  ;;  %v380_v14 = vld [vmem:[#allocation2 + $0x160] sm:$0xff]  ;;  %v56_v16 = vld [vmem:[%s3325_s0 + $0x28] sm:$0xff]  ;;  %v2946_v17 = vpack.c.bf16 %v381_v6, %v377_v5 }
  0x39   :  { %1991 = vmatpush1.bf16.msra.mxu0 %v2916_v56  ;;  %2023 = vmatpush1.bf16.msra.mxu1 %v2920_v60  ;;  %v378_v18 = vld [vmem:[#allocation2 + $0x150] sm:$0xff]  ;;  %v2950_v21 = vpack.c.bf16 %v383_v9, %v379_v8  ;;  %v385_v22 = vld [vmem:[#allocation2 + $0x188] sm:$0xff]  ;;  %v2954_v26 = vpack.c.bf16 %v380_v14, %v376_v13  ;;  %v387_v27 = vld [vmem:[#allocation2 + $0x198] sm:$0xff] }
  0x3a   :  { %1904 = vmatmul.mubr.msk.f32.gmra.mrb[8].mxu0 %vm85_vm0, %v55_v63  ;;  %1912 = vmatmul.mubr.msk.f32.gmra.mrb[8].mxu1 %vm85_vm0, %v55_v63  ;;  %v382_v20 = vld [vmem:[#allocation2 + $0x170] sm:$0xff]  ;;  %v389_v25 = vld [vmem:[#allocation2 + $0x1a8] sm:$0xff]  ;;  %v391_v29 = vld [vmem:[#allocation2 + $0x1b8] sm:$0xff]  ;;  %v66_v63 = vshrl.u32 %v65_v62, 7 }
  0x3b   :  { %1993 = vmatprep.subr.bf16.mxu0 %v2927_v1  ;;  %2025 = vmatprep.subr.bf16.mxu1 %v2931_v4  ;;  %v2958_v30 = vpack.c.bf16 %v382_v20, %v378_v18  ;;  %v384_v31 = vld [vmem:[#allocation2 + $0x180] sm:$0xff]  ;;  %v57_v34 = vld [vmem:[%s3325_s0 + $0x30] sm:$0xff]  ;;  %v2965_v35 = vpack.c.bf16 %v389_v25, %v385_v22  ;;  %v2969_v40 = vpack.c.bf16 %v391_v29, %v387_v27  ;;  %v393_v42 = vld [vmem:[#allocation2 + $0x1c8] sm:$0xff] }
  0x3c   :  { %204 = vmatprep.mubr.f32.mxu0 %v2778_v0  ;;  %317 = vmatprep.mubr.f32.mxu1 %v2778_v0  ;;  %v388_v33 = vld [vmem:[#allocation2 + $0x1a0] sm:$0xff]  ;;  %v386_v38 = vld [vmem:[#allocation2 + $0x190] sm:$0xff]  ;;  %v397_v43 = vld [vmem:[#allocation2 + $0x1e8] sm:$0xff]  ;;  %v67_v2 = vsub.s32 0, %v66_v63  ;;  %v71_v5 = vsub.s32 1, %v66_v63  ;;  %v75_v13 = vsub.s32 2, %v66_v63 }
  0x3d   :  { %1995 = vmatpush1.bf16.msra.mxu0 %v2935_v7  ;;  %2027 = vmatpush1.bf16.msra.mxu1 %v2939_v12  ;;  %v390_v39 = vld [vmem:[#allocation2 + $0x1b0] sm:$0xff]  ;;  %v2973_v44 = vpack.c.bf16 %v388_v33, %v384_v31  ;;  %v395_v46 = vld [vmem:[#allocation2 + $0x1d8] sm:$0xff]  ;;  %v392_v50 = vld [vmem:[#allocation2 + $0x1c0] sm:$0xff]  ;;  %v2984_v54 = vpack.c.bf16 %v397_v43, %v393_v42  ;;  %v79_v31 = vsub.s32 3, %v66_v63 }
  0x3e   :  { %1905 = vmatmul.mubr.msk.f32.gmra.mrb[10].mxu0 %vm85_vm0, %v56_v16  ;;  %1913 = vmatmul.mubr.msk.f32.gmra.mrb[10].mxu1 %vm85_vm0, %v56_v16  ;;  %v399_v47 = vld [vmem:[#allocation2 + $0x1f8] sm:$0xff]  ;;  %v2977_v48 = vpack.c.bf16 %v390_v39, %v386_v38  ;;  %v396_v51 = vld [vmem:[#allocation2 + $0x1e0] sm:$0xff]  ;;  %v394_v55 = vld [vmem:[#allocation2 + $0x1d0] sm:$0xff] }
  0x3f   :  { %1997 = vmatprep.subr.bf16.mxu0 %v2946_v17  ;;  %2029 = vmatprep.subr.bf16.mxu1 %v2950_v21  ;;  %v58_v52 = vld [vmem:[%s3325_s0 + $0x38] sm:$0xff]  ;;  %v398_v57 = vld [vmem:[#allocation2 + $0x1f0] sm:$0xff]  ;;  %v2988_v58 = vpack.c.bf16 %v399_v47, %v395_v46  ;;  %v2992_v59 = vpack.c.bf16 %v396_v51, %v392_v50  ;;  %v63_v3 = vld [vmem:[%s3327_s2] sm:$0xf] }
  0x40   :  { %210 = vmatprep.mubr.f32.mxu0 %v2778_v0  ;;  %323 = vmatprep.mubr.f32.mxu1 %v2778_v0  ;;  %v2996_v61 = vpack.c.bf16 %v398_v57, %v394_v55  ;;  %v3046_v6 = vrot.slane %v63_v3, %v67_v2  ;;  %v3048_v8 = vrot.slane %v63_v3, %v71_v5 }
  0x41   :  { %1999 = vmatpush1.bf16.msra.mxu0 %v2954_v26  ;;  %2031 = vmatpush1.bf16.msra.mxu1 %v2958_v30  ;;  %v3052_v27 = vrot.slane %v63_v3, %v75_v13 }
  0x42   :  { %1906 = vmatmul.mubr.msk.f32.gmra.mrb[12].mxu0 %vm85_vm0, %v57_v34  ;;  %1914 = vmatmul.mubr.msk.f32.gmra.mrb[12].mxu1 %vm85_vm0, %v57_v34  ;;  %v3055_v34 = vrot.slane %v63_v3, %v79_v31 }
  0x43   :  { %2001 = vmatprep.subr.bf16.mxu0 %v2965_v35  ;;  %2033 = vmatprep.subr.bf16.mxu1 %v2969_v40 }
  0x44   :  { %216 = vmatprep.mubr.f32.mxu0 %v2778_v0  ;;  %329 = vmatprep.mubr.f32.mxu1 %v2778_v0 }
  0x45   :  { %2003 = vmatpush1.bf16.msra.mxu0 %v2973_v44  ;;  %2035 = vmatpush1.bf16.msra.mxu1 %v2977_v48 }
  0x46   :  { %1907 = vmatmul.mubr.msk.f32.gmra.mrb[14].mxu0 %vm85_vm0, %v58_v52  ;;  %1915 = vmatmul.mubr.msk.f32.gmra.mrb[14].mxu1 %vm85_vm0, %v58_v52 }
  0x47   :  { %2005 = vmatprep.subr.bf16.mxu0 %v2984_v54  ;;  %2037 = vmatprep.subr.bf16.mxu1 %v2988_v58 }
  0x48   :  { %464 = vmatprep.mubr.f32.mxu0 %v2778_v0  ;;  %535 = vmatprep.mubr.f32.mxu1 %v2778_v0 }
  0x49   :  { %2007 = vmatpush1.bf16.msra.mxu0 %v2992_v59  ;;  %2039 = vmatpush1.bf16.msra.mxu1 %v2996_v61 }
  0x4a   :  { %2041 = vmatprep.subr.bf16.mxu0 %v2858_v10  ;;  %2073 = vmatprep.subr.bf16.mxu1 %v2860_v11 }
  0x4c   :  { %465 = vmatmul.mubr.f32.vlgmr.msra.gmra.mrb[0].mxu0 %v2778_v0  ;;  %536 = vmatmul.mubr.f32.vlgmr.msra.gmra.mrb[0].mxu1 %v2778_v0 }
  0x4d   :  { %2043 = vmatpush1.bf16.msra.mxu0 %v2862_v15  ;;  %2075 = vmatpush1.bf16.msra.mxu1 %v2871_v19 }
  0x4e   :  { %2045 = vmatprep.subr.bf16.mxu0 %v2874_v23  ;;  %2077 = vmatprep.subr.bf16.mxu1 %v2876_v24 }
  0x4f   :  { %634 = vmatprep.mubr.f32.mxu0 %v2778_v0  ;;  %705 = vmatprep.mubr.f32.mxu1 %v2778_v0 }
  0x51   :  { %2047 = vmatpush1.bf16.msra.mxu0 %v2880_v28  ;;  %2079 = vmatpush1.bf16.msra.mxu1 %v2887_v32 }
  0x52   :  { %2049 = vmatprep.subr.bf16.mxu0 %v2891_v36  ;;  %2081 = vmatprep.subr.bf16.mxu1 %v2893_v37 }
  0x55   :  { %2051 = vmatpush1.bf16.msra.mxu0 %v2897_v41  ;;  %2083 = vmatpush1.bf16.msra.mxu1 %v2904_v45 }
  0x56   :  { %2053 = vmatprep.subr.bf16.mxu0 %v2908_v49  ;;  %2085 = vmatprep.subr.bf16.mxu1 %v2912_v53 }
  0x59   :  { %2055 = vmatpush1.bf16.msra.mxu0 %v2916_v56  ;;  %2087 = vmatpush1.bf16.msra.mxu1 %v2920_v60 }
  0x5a   :  { %2057 = vmatprep.subr.bf16.mxu0 %v2927_v1  ;;  %2089 = vmatprep.subr.bf16.mxu1 %v2931_v4 }
  0x5d   :  { %2059 = vmatpush1.bf16.msra.mxu0 %v2935_v7  ;;  %2091 = vmatpush1.bf16.msra.mxu1 %v2939_v12 }
  0x5e   :  { %2061 = vmatprep.subr.bf16.mxu0 %v2946_v17  ;;  %2093 = vmatprep.subr.bf16.mxu1 %v2950_v21 }
  0x61   :  { %2063 = vmatpush1.bf16.msra.mxu0 %v2954_v26  ;;  %2095 = vmatpush1.bf16.msra.mxu1 %v2958_v30 }
  0x62   :  { %2065 = vmatprep.subr.bf16.mxu0 %v2965_v35  ;;  %2097 = vmatprep.subr.bf16.mxu1 %v2969_v40 }
  0x65   :  { %2067 = vmatpush1.bf16.msra.mxu0 %v2973_v44  ;;  %2099 = vmatpush1.bf16.msra.mxu1 %v2977_v48 }
  0x66   :  { %2069 = vmatprep.subr.bf16.mxu0 %v2984_v54  ;;  %2101 = vmatprep.subr.bf16.mxu1 %v2988_v58 }
  0x69   :  { %2071 = vmatpush1.bf16.msra.mxu0 %v2992_v59  ;;  %2103 = vmatpush1.bf16.msra.mxu1 %v2996_v61 }
  0x6a   :  { %2105 = vmatprep.subr.bf16.mxu0 %v2858_v10  ;;  %2137 = vmatprep.subr.bf16.mxu1 %v2860_v11 }
 0x11f   :  { %v466_v9 = vpop.f32.mrb[0].mxu0  ;;  %v537_v16 = vpop.f32.mrb[0].mxu1 }
 0x120   :  { %v2520_v14 = vadd.f32 %v466_v9, %v3046_v6  ;;  %v468_v18 = vpop.f32.mrb[1].mxu0  ;;  %v539_v22 = vpop.f32.mrb[1].mxu1  ;;  %v2536_v33 = vadd.f32 %v537_v16, %v3052_v27 }
 0x121   :  { %v2521_v20 = vadd.f32 %v468_v18, %v3048_v8  ;;  %v2537_v39 = vadd.f32 %v539_v22, %v3055_v34 }
 0x122   :  { %v1916_v25 = vmul.f32 -1.442695, %v2520_v14  ;;  %v1918_v38 = vmul.f32 -1.442695, %v2536_v33 }
 0x123   :  { %v1917_v29 = vmul.f32 -1.442695, %v2521_v20 }
 0x124   :  { %2592 = vpow2.f32 %v1916_v25 }
 0x125   :  { %2594 = vpow2.f32 %v1917_v29 }
 0x126   :  { %2596 = vpow2.f32 %v1918_v38 }
 0x127   :  { %2598 = vtanh.f32 %v2537_v39 }
 0x12e   :  { %v2593_v42 = vpop.eup %2592 }
 0x12f   :  { %v555_v43 = vadd.f32 1.0, %v2593_v42  ;;  %v2595_v46 = vpop.eup %2594 }
 0x130   :  { %v556_v47 = vadd.f32 1.0, %v2595_v46  ;;  %v2597_v50 = vpop.eup %2596 }
 0x131   :  { %2600 = vrcp.f32 %v555_v43  ;;  %v2599_v51 = vpop.eup %2598  ;;  %v557_v62 = vadd.f32 1.0, %v2597_v50 }
 0x132   :  { %2602 = vrcp.f32 %v556_v47 }
 0x133   :  { %2604 = vrcp.f32 %v557_v62 }
 0x13b   :  { %v2601_v52 = vpop.eup %2600 }
 0x13c   :  { %v566_v55 = vmul.f32 %v2601_v52, %v2599_v51  ;;  %v2603_v57 = vpop.eup %2602 }
 0x13d   :  { %v565_v63 = vmul.f32 0.0, %v2603_v57  ;;  %v2605_v3 = vpop.eup %2604 }
 0x13f   :  { %v3058_v2 = vadd.f32 %v566_v55, %v565_v63 }
 0x141   :  { %2606 = vtanh.f32 %v3058_v2 }
 0x14b   :  { %v2607_v5 = vpop.eup %2606 }
 0x14c   :  { %v569_v9 = vmul.f32 %v2607_v5, %v2605_v3 }
 0x14e   :  { %635 = vmatmul.mubr.f32.vlgmr.msra.gmra.mrb[2].mxu0 %v569_v9  ;;  %706 = vmatmul.mubr.f32.vlgmr.msra.gmra.mrb[2].mxu1 %v569_v9 }
 0x14f   :  { %2107 = vmatpush1.bf16.msra.mxu0 %v2862_v15  ;;  %2139 = vmatpush1.bf16.msra.mxu1 %v2871_v19 }
 0x150   :  { %2109 = vmatprep.subr.bf16.mxu0 %v2874_v23  ;;  %2141 = vmatprep.subr.bf16.mxu1 %v2876_v24 }
 0x151   :  { %804 = vmatprep.mubr.f32.mxu0 %v2778_v0  ;;  %875 = vmatprep.mubr.f32.mxu1 %v2778_v0 }
 0x153   :  { %2111 = vmatpush1.bf16.msra.mxu0 %v2880_v28  ;;  %2143 = vmatpush1.bf16.msra.mxu1 %v2887_v32 }
 0x154   :  { %2113 = vmatprep.subr.bf16.mxu0 %v2891_v36  ;;  %2145 = vmatprep.subr.bf16.mxu1 %v2893_v37 }
 0x157   :  { %2115 = vmatpush1.bf16.msra.mxu0 %v2897_v41  ;;  %2147 = vmatpush1.bf16.msra.mxu1 %v2904_v45 }
 0x158   :  { %2117 = vmatprep.subr.bf16.mxu0 %v2908_v49  ;;  %2149 = vmatprep.subr.bf16.mxu1 %v2912_v53 }
 0x15b   :  { %2119 = vmatpush1.bf16.msra.mxu0 %v2916_v56  ;;  %2151 = vmatpush1.bf16.msra.mxu1 %v2920_v60 }
 0x15c   :  { %2121 = vmatprep.subr.bf16.mxu0 %v2927_v1  ;;  %2153 = vmatprep.subr.bf16.mxu1 %v2931_v4 }
 0x15f   :  { %2123 = vmatpush1.bf16.msra.mxu0 %v2935_v7  ;;  %2155 = vmatpush1.bf16.msra.mxu1 %v2939_v12 }
 0x160   :  { %2125 = vmatprep.subr.bf16.mxu0 %v2946_v17  ;;  %2157 = vmatprep.subr.bf16.mxu1 %v2950_v21 }
 0x163   :  { %2127 = vmatpush1.bf16.msra.mxu0 %v2954_v26  ;;  %2159 = vmatpush1.bf16.msra.mxu1 %v2958_v30 }
 0x164   :  { %2129 = vmatprep.subr.bf16.mxu0 %v2965_v35  ;;  %2161 = vmatprep.subr.bf16.mxu1 %v2969_v40 }
 0x167   :  { %2131 = vmatpush1.bf16.msra.mxu0 %v2973_v44  ;;  %2163 = vmatpush1.bf16.msra.mxu1 %v2977_v48 }
 0x168   :  { %2133 = vmatprep.subr.bf16.mxu0 %v2984_v54  ;;  %2165 = vmatprep.subr.bf16.mxu1 %v2988_v58 }
 0x16b   :  { %2135 = vmatpush1.bf16.msra.mxu0 %v2992_v59  ;;  %2167 = vmatpush1.bf16.msra.mxu1 %v2996_v61 }
 0x16c   :  { %2169 = vmatprep.subr.bf16.mxu0 %v2858_v10  ;;  %2201 = vmatprep.subr.bf16.mxu1 %v2860_v11 }
 0x221   :  { %v636_v13 = vpop.f32.mrb[2].mxu0  ;;  %v707_v14 = vpop.f32.mrb[2].mxu1 }
 0x222   :  { %v2522_v16 = vadd.f32 %v636_v13, %v3046_v6  ;;  %v638_v18 = vpop.f32.mrb[3].mxu0  ;;  %v709_v20 = vpop.f32.mrb[3].mxu1  ;;  %v2538_v31 = vadd.f32 %v707_v14, %v3052_v27 }
 0x223   :  { %v2523_v22 = vadd.f32 %v638_v18, %v3048_v8  ;;  %v2539_v33 = vadd.f32 %v709_v20, %v3055_v34 }
 0x224   :  { %v1919_v25 = vmul.f32 -1.442695, %v2522_v16  ;;  %v1921_v38 = vmul.f32 -1.442695, %v2538_v31 }
 0x225   :  { %v1920_v29 = vmul.f32 -1.442695, %v2523_v22 }
 0x226   :  { %2608 = vpow2.f32 %v1919_v25 }
 0x227   :  { %2610 = vpow2.f32 %v1920_v29 }
 0x228   :  { %2612 = vtanh.f32 %v2539_v33 }
 0x229   :  { %2614 = vpow2.f32 %v1921_v38 }
 0x230   :  { %v2609_v39 = vpop.eup %2608 }
 0x231   :  { %v725_v42 = vadd.f32 1.0, %v2609_v39  ;;  %v2611_v43 = vpop.eup %2610 }
 0x232   :  { %v726_v46 = vadd.f32 1.0, %v2611_v43  ;;  %v2613_v47 = vpop.eup %2612 }
 0x233   :  { %2616 = vrcp.f32 %v725_v42  ;;  %v2615_v50 = vpop.eup %2614 }
 0x234   :  { %2618 = vrcp.f32 %v726_v46  ;;  %v727_v57 = vadd.f32 1.0, %v2615_v50 }
 0x236   :  { %2620 = vrcp.f32 %v727_v57 }
 0x23d   :  { %v2617_v51 = vpop.eup %2616 }
 0x23e   :  { %v736_v52 = vmul.f32 %v2617_v51, %v2613_v47  ;;  %v2619_v55 = vpop.eup %2618 }
 0x23f   :  { %v735_v62 = vmul.f32 %v2619_v55, %v3058_v2 }
 0x240   :  { %v2621_v3 = vpop.eup %2620 }
 0x241   :  { %v3100_v63 = vadd.f32 %v736_v52, %v735_v62 }
 0x243   :  { %2622 = vtanh.f32 %v3100_v63 }
 0x24d   :  { %v2623_v5 = vpop.eup %2622 }
 0x24e   :  { %v739_v9 = vmul.f32 %v2623_v5, %v2621_v3 }
 0x250   :  { %805 = vmatmul.mubr.f32.vlgmr.msra.gmra.mrb[4].mxu0 %v739_v9  ;;  %876 = vmatmul.mubr.f32.vlgmr.msra.gmra.mrb[4].mxu1 %v739_v9 }
 0x251   :  { %2171 = vmatpush1.bf16.msra.mxu0 %v2862_v15  ;;  %2203 = vmatpush1.bf16.msra.mxu1 %v2871_v19 }
 0x252   :  { %2173 = vmatprep.subr.bf16.mxu0 %v2874_v23  ;;  %2205 = vmatprep.subr.bf16.mxu1 %v2876_v24 }
 0x253   :  { %974 = vmatprep.mubr.f32.mxu0 %v2778_v0  ;;  %1045 = vmatprep.mubr.f32.mxu1 %v2778_v0 }
 0x255   :  { %2175 = vmatpush1.bf16.msra.mxu0 %v2880_v28  ;;  %2207 = vmatpush1.bf16.msra.mxu1 %v2887_v32 }
 0x256   :  { %2177 = vmatprep.subr.bf16.mxu0 %v2891_v36  ;;  %2209 = vmatprep.subr.bf16.mxu1 %v2893_v37 }
 0x259   :  { %2179 = vmatpush1.bf16.msra.mxu0 %v2897_v41  ;;  %2211 = vmatpush1.bf16.msra.mxu1 %v2904_v45 }
 0x25a   :  { %2181 = vmatprep.subr.bf16.mxu0 %v2908_v49  ;;  %2213 = vmatprep.subr.bf16.mxu1 %v2912_v53 }
 0x25d   :  { %2183 = vmatpush1.bf16.msra.mxu0 %v2916_v56  ;;  %2215 = vmatpush1.bf16.msra.mxu1 %v2920_v60 }
 0x25e   :  { %2185 = vmatprep.subr.bf16.mxu0 %v2927_v1  ;;  %2217 = vmatprep.subr.bf16.mxu1 %v2931_v4 }
 0x261   :  { %2187 = vmatpush1.bf16.msra.mxu0 %v2935_v7  ;;  %2219 = vmatpush1.bf16.msra.mxu1 %v2939_v12 }
 0x262   :  { %2189 = vmatprep.subr.bf16.mxu0 %v2946_v17  ;;  %2221 = vmatprep.subr.bf16.mxu1 %v2950_v21 }
 0x265   :  { %2191 = vmatpush1.bf16.msra.mxu0 %v2954_v26  ;;  %2223 = vmatpush1.bf16.msra.mxu1 %v2958_v30 }
 0x266   :  { %2193 = vmatprep.subr.bf16.mxu0 %v2965_v35  ;;  %2225 = vmatprep.subr.bf16.mxu1 %v2969_v40 }
 0x269   :  { %2195 = vmatpush1.bf16.msra.mxu0 %v2973_v44  ;;  %2227 = vmatpush1.bf16.msra.mxu1 %v2977_v48 }
 0x26a   :  { %2197 = vmatprep.subr.bf16.mxu0 %v2984_v54  ;;  %2229 = vmatprep.subr.bf16.mxu1 %v2988_v58 }
 0x26d   :  { %2199 = vmatpush1.bf16.msra.mxu0 %v2992_v59  ;;  %2231 = vmatpush1.bf16.msra.mxu1 %v2996_v61 }
 0x26e   :  { %2233 = vmatprep.subr.bf16.mxu0 %v2858_v10  ;;  %2265 = vmatprep.subr.bf16.mxu1 %v2860_v11 }
 0x323   :  { %v806_v2 = vpop.f32.mrb[4].mxu0  ;;  %v877_v13 = vpop.f32.mrb[4].mxu1 }
 0x324   :  { %v2524_v14 = vadd.f32 %v806_v2, %v3046_v6  ;;  %v808_v16 = vpop.f32.mrb[5].mxu0  ;;  %v879_v18 = vpop.f32.mrb[5].mxu1  ;;  %v2540_v29 = vadd.f32 %v877_v13, %v3052_v27 }
 0x325   :  { %v2525_v20 = vadd.f32 %v808_v16, %v3048_v8  ;;  %v2541_v31 = vadd.f32 %v879_v18, %v3055_v34 }
 0x326   :  { %v1922_v22 = vmul.f32 -1.442695, %v2524_v14  ;;  %v1924_v33 = vmul.f32 -1.442695, %v2540_v29 }
 0x327   :  { %v1923_v25 = vmul.f32 -1.442695, %v2525_v20 }
 0x328   :  { %2624 = vpow2.f32 %v1922_v22 }
 0x329   :  { %2626 = vpow2.f32 %v1923_v25 }
 0x32a   :  { %2628 = vtanh.f32 %v2541_v31 }
 0x32b   :  { %2630 = vpow2.f32 %v1924_v33 }
 0x332   :  { %v2625_v38 = vpop.eup %2624 }
 0x333   :  { %v895_v39 = vadd.f32 1.0, %v2625_v38  ;;  %v2627_v42 = vpop.eup %2626 }
 0x334   :  { %v896_v43 = vadd.f32 1.0, %v2627_v42  ;;  %v2629_v46 = vpop.eup %2628 }
 0x335   :  { %2632 = vrcp.f32 %v895_v39  ;;  %v2631_v47 = vpop.eup %2630 }
 0x336   :  { %2634 = vrcp.f32 %v896_v43  ;;  %v897_v55 = vadd.f32 1.0, %v2631_v47 }
 0x338   :  { %2636 = vrcp.f32 %v897_v55 }
 0x33f   :  { %v2633_v50 = vpop.eup %2632 }
 0x340   :  { %v906_v51 = vmul.f32 %v2633_v50, %v2629_v46  ;;  %v2635_v52 = vpop.eup %2634 }
 0x341   :  { %v905_v57 = vmul.f32 %v2635_v52, %v3100_v63 }
 0x342   :  { %v2637_v3 = vpop.eup %2636 }
 0x343   :  { %v3142_v62 = vadd.f32 %v906_v51, %v905_v57 }
 0x345   :  { %2638 = vtanh.f32 %v3142_v62 }
 0x34f   :  { %v2639_v5 = vpop.eup %2638 }
 0x350   :  { %v909_v9 = vmul.f32 %v2639_v5, %v2637_v3 }
 0x352   :  { %975 = vmatmul.mubr.f32.vlgmr.msra.gmra.mrb[6].mxu0 %v909_v9  ;;  %1046 = vmatmul.mubr.f32.vlgmr.msra.gmra.mrb[6].mxu1 %v909_v9 }
 0x353   :  { %2235 = vmatpush1.bf16.msra.mxu0 %v2862_v15  ;;  %2267 = vmatpush1.bf16.msra.mxu1 %v2871_v19 }
 0x354   :  { %2237 = vmatprep.subr.bf16.mxu0 %v2874_v23  ;;  %2269 = vmatprep.subr.bf16.mxu1 %v2876_v24 }
 0x355   :  { %1144 = vmatprep.mubr.f32.mxu0 %v2778_v0  ;;  %1215 = vmatprep.mubr.f32.mxu1 %v2778_v0 }
 0x357   :  { %2239 = vmatpush1.bf16.msra.mxu0 %v2880_v28  ;;  %2271 = vmatpush1.bf16.msra.mxu1 %v2887_v32 }
 0x358   :  { %2241 = vmatprep.subr.bf16.mxu0 %v2891_v36  ;;  %2273 = vmatprep.subr.bf16.mxu1 %v2893_v37 }
 0x35b   :  { %2243 = vmatpush1.bf16.msra.mxu0 %v2897_v41  ;;  %2275 = vmatpush1.bf16.msra.mxu1 %v2904_v45 }
 0x35c   :  { %2245 = vmatprep.subr.bf16.mxu0 %v2908_v49  ;;  %2277 = vmatprep.subr.bf16.mxu1 %v2912_v53 }
 0x35f   :  { %2247 = vmatpush1.bf16.msra.mxu0 %v2916_v56  ;;  %2279 = vmatpush1.bf16.msra.mxu1 %v2920_v60 }
 0x360   :  { %2249 = vmatprep.subr.bf16.mxu0 %v2927_v1  ;;  %2281 = vmatprep.subr.bf16.mxu1 %v2931_v4 }
 0x363   :  { %2251 = vmatpush1.bf16.msra.mxu0 %v2935_v7  ;;  %2283 = vmatpush1.bf16.msra.mxu1 %v2939_v12 }
 0x364   :  { %2253 = vmatprep.subr.bf16.mxu0 %v2946_v17  ;;  %2285 = vmatprep.subr.bf16.mxu1 %v2950_v21 }
 0x367   :  { %2255 = vmatpush1.bf16.msra.mxu0 %v2954_v26  ;;  %2287 = vmatpush1.bf16.msra.mxu1 %v2958_v30 }
 0x368   :  { %2257 = vmatprep.subr.bf16.mxu0 %v2965_v35  ;;  %2289 = vmatprep.subr.bf16.mxu1 %v2969_v40 }
 0x36b   :  { %2259 = vmatpush1.bf16.msra.mxu0 %v2973_v44  ;;  %2291 = vmatpush1.bf16.msra.mxu1 %v2977_v48 }
 0x36c   :  { %2261 = vmatprep.subr.bf16.mxu0 %v2984_v54  ;;  %2293 = vmatprep.subr.bf16.mxu1 %v2988_v58 }
 0x36f   :  { %2263 = vmatpush1.bf16.msra.mxu0 %v2992_v59  ;;  %2295 = vmatpush1.bf16.msra.mxu1 %v2996_v61 }
 0x370   :  { %2297 = vmatprep.subr.bf16.mxu0 %v2858_v10  ;;  %2329 = vmatprep.subr.bf16.mxu1 %v2860_v11 }
 0x425   :  { %v976_v63 = vpop.f32.mrb[6].mxu0  ;;  %v1047_v2 = vpop.f32.mrb[6].mxu1 }
 0x426   :  { %v2526_v13 = vadd.f32 %v976_v63, %v3046_v6  ;;  %v978_v14 = vpop.f32.mrb[7].mxu0  ;;  %v1049_v16 = vpop.f32.mrb[7].mxu1  ;;  %v2542_v25 = vadd.f32 %v1047_v2, %v3052_v27 }
 0x427   :  { %v2527_v18 = vadd.f32 %v978_v14, %v3048_v8  ;;  %v2543_v29 = vadd.f32 %v1049_v16, %v3055_v34 }
 0x428   :  { %v1925_v20 = vmul.f32 -1.442695, %v2526_v13  ;;  %v1927_v31 = vmul.f32 -1.442695, %v2542_v25 }
 0x429   :  { %v1926_v22 = vmul.f32 -1.442695, %v2527_v18 }
 0x42a   :  { %2640 = vpow2.f32 %v1925_v20 }
 0x42b   :  { %2642 = vpow2.f32 %v1926_v22 }
 0x42c   :  { %2644 = vtanh.f32 %v2543_v29 }
 0x42d   :  { %2646 = vpow2.f32 %v1927_v31 }
 0x434   :  { %v2641_v33 = vpop.eup %2640 }
 0x435   :  { %v1065_v38 = vadd.f32 1.0, %v2641_v33  ;;  %v2643_v39 = vpop.eup %2642 }
 0x436   :  { %v1066_v42 = vadd.f32 1.0, %v2643_v39  ;;  %v2645_v43 = vpop.eup %2644 }
 0x437   :  { %2648 = vrcp.f32 %v1065_v38  ;;  %v2647_v46 = vpop.eup %2646 }
 0x438   :  { %2650 = vrcp.f32 %v1066_v42  ;;  %v1067_v52 = vadd.f32 1.0, %v2647_v46 }
 0x43a   :  { %2652 = vrcp.f32 %v1067_v52 }
 0x441   :  { %v2649_v47 = vpop.eup %2648 }
 0x442   :  { %v1076_v50 = vmul.f32 %v2649_v47, %v2645_v43  ;;  %v2651_v51 = vpop.eup %2650 }
 0x443   :  { %v1075_v55 = vmul.f32 %v2651_v51, %v3142_v62 }
 0x444   :  { %v2653_v3 = vpop.eup %2652 }
 0x445   :  { %v3184_v57 = vadd.f32 %v1076_v50, %v1075_v55 }
 0x447   :  { %2654 = vtanh.f32 %v3184_v57 }
 0x451   :  { %v2655_v5 = vpop.eup %2654 }
 0x452   :  { %v1079_v9 = vmul.f32 %v2655_v5, %v2653_v3 }
 0x454   :  { %1145 = vmatmul.mubr.f32.vlgmr.msra.gmra.mrb[8].mxu0 %v1079_v9  ;;  %1216 = vmatmul.mubr.f32.vlgmr.msra.gmra.mrb[8].mxu1 %v1079_v9 }
 0x455   :  { %2299 = vmatpush1.bf16.msra.mxu0 %v2862_v15  ;;  %2331 = vmatpush1.bf16.msra.mxu1 %v2871_v19 }
 0x456   :  { %2301 = vmatprep.subr.bf16.mxu0 %v2874_v23  ;;  %2333 = vmatprep.subr.bf16.mxu1 %v2876_v24 }
 0x457   :  { %1314 = vmatprep.mubr.f32.mxu0 %v2778_v0  ;;  %1385 = vmatprep.mubr.f32.mxu1 %v2778_v0 }
 0x459   :  { %2303 = vmatpush1.bf16.msra.mxu0 %v2880_v28  ;;  %2335 = vmatpush1.bf16.msra.mxu1 %v2887_v32 }
 0x45a   :  { %2305 = vmatprep.subr.bf16.mxu0 %v2891_v36  ;;  %2337 = vmatprep.subr.bf16.mxu1 %v2893_v37 }
 0x45d   :  { %2307 = vmatpush1.bf16.msra.mxu0 %v2897_v41  ;;  %2339 = vmatpush1.bf16.msra.mxu1 %v2904_v45 }
 0x45e   :  { %2309 = vmatprep.subr.bf16.mxu0 %v2908_v49  ;;  %2341 = vmatprep.subr.bf16.mxu1 %v2912_v53 }
 0x461   :  { %2311 = vmatpush1.bf16.msra.mxu0 %v2916_v56  ;;  %2343 = vmatpush1.bf16.msra.mxu1 %v2920_v60 }
 0x462   :  { %2313 = vmatprep.subr.bf16.mxu0 %v2927_v1  ;;  %2345 = vmatprep.subr.bf16.mxu1 %v2931_v4 }
 0x465   :  { %2315 = vmatpush1.bf16.msra.mxu0 %v2935_v7  ;;  %2347 = vmatpush1.bf16.msra.mxu1 %v2939_v12 }
 0x466   :  { %2317 = vmatprep.subr.bf16.mxu0 %v2946_v17  ;;  %2349 = vmatprep.subr.bf16.mxu1 %v2950_v21 }
 0x469   :  { %2319 = vmatpush1.bf16.msra.mxu0 %v2954_v26  ;;  %2351 = vmatpush1.bf16.msra.mxu1 %v2958_v30 }
 0x46a   :  { %2321 = vmatprep.subr.bf16.mxu0 %v2965_v35  ;;  %2353 = vmatprep.subr.bf16.mxu1 %v2969_v40 }
 0x46d   :  { %2323 = vmatpush1.bf16.msra.mxu0 %v2973_v44  ;;  %2355 = vmatpush1.bf16.msra.mxu1 %v2977_v48 }
 0x46e   :  { %2325 = vmatprep.subr.bf16.mxu0 %v2984_v54  ;;  %2357 = vmatprep.subr.bf16.mxu1 %v2988_v58 }
 0x471   :  { %2327 = vmatpush1.bf16.msra.mxu0 %v2992_v59  ;;  %2359 = vmatpush1.bf16.msra.mxu1 %v2996_v61 }
 0x472   :  { %2361 = vmatprep.subr.bf16.mxu0 %v2858_v10  ;;  %2393 = vmatprep.subr.bf16.mxu1 %v2860_v11 }
 0x527   :  { %v1146_v62 = vpop.f32.mrb[8].mxu0  ;;  %v1217_v63 = vpop.f32.mrb[8].mxu1 }
 0x528   :  { %v2528_v2 = vadd.f32 %v1146_v62, %v3046_v6  ;;  %v1148_v13 = vpop.f32.mrb[9].mxu0  ;;  %v1219_v14 = vpop.f32.mrb[9].mxu1  ;;  %v2544_v22 = vadd.f32 %v1217_v63, %v3052_v27 }
 0x529   :  { %v2529_v16 = vadd.f32 %v1148_v13, %v3048_v8  ;;  %v2545_v25 = vadd.f32 %v1219_v14, %v3055_v34 }
 0x52a   :  { %v1928_v18 = vmul.f32 -1.442695, %v2528_v2  ;;  %v1930_v29 = vmul.f32 -1.442695, %v2544_v22 }
 0x52b   :  { %v1929_v20 = vmul.f32 -1.442695, %v2529_v16 }
 0x52c   :  { %2656 = vpow2.f32 %v1928_v18 }
 0x52d   :  { %2658 = vpow2.f32 %v1929_v20 }
 0x52e   :  { %2660 = vtanh.f32 %v2545_v25 }
 0x52f   :  { %2662 = vpow2.f32 %v1930_v29 }
 0x536   :  { %v2657_v31 = vpop.eup %2656 }
 0x537   :  { %v1235_v33 = vadd.f32 1.0, %v2657_v31  ;;  %v2659_v38 = vpop.eup %2658 }
 0x538   :  { %v1236_v39 = vadd.f32 1.0, %v2659_v38  ;;  %v2661_v42 = vpop.eup %2660 }
 0x539   :  { %2664 = vrcp.f32 %v1235_v33  ;;  %v2663_v43 = vpop.eup %2662 }
 0x53a   :  { %2666 = vrcp.f32 %v1236_v39  ;;  %v1237_v51 = vadd.f32 1.0, %v2663_v43 }
 0x53c   :  { %2668 = vrcp.f32 %v1237_v51 }
 0x543   :  { %v2665_v46 = vpop.eup %2664 }
 0x544   :  { %v1246_v47 = vmul.f32 %v2665_v46, %v2661_v42  ;;  %v2667_v50 = vpop.eup %2666 }
 0x545   :  { %v1245_v52 = vmul.f32 %v2667_v50, %v3184_v57 }
 0x546   :  { %v2669_v3 = vpop.eup %2668 }
 0x547   :  { %v3226_v55 = vadd.f32 %v1246_v47, %v1245_v52 }
 0x549   :  { %2670 = vtanh.f32 %v3226_v55 }
 0x553   :  { %v2671_v5 = vpop.eup %2670 }
 0x554   :  { %v1249_v9 = vmul.f32 %v2671_v5, %v2669_v3  ;;  %v1778_v5 = vld [vmem:[#allocation4 + $0x90] sm:$0xff] }
 0x556   :  { %1315 = vmatmul.mubr.f32.vlgmr.msra.gmra.mrb[10].mxu0 %v1249_v9  ;;  %1386 = vmatmul.mubr.f32.vlgmr.msra.gmra.mrb[10].mxu1 %v1249_v9  ;;  %v1779_v9 = vld [vmem:[#allocation4 + $0x98] sm:$0xff] }
 0x557   :  { %2363 = vmatpush1.bf16.msra.mxu0 %v2862_v15  ;;  %2395 = vmatpush1.bf16.msra.mxu1 %v2871_v19 }
 0x558   :  { %2365 = vmatprep.subr.bf16.mxu0 %v2874_v23  ;;  %2397 = vmatprep.subr.bf16.mxu1 %v2876_v24 }
 0x559   :  { %1484 = vmatprep.mubr.f32.mxu0 %v2778_v0  ;;  %1555 = vmatprep.mubr.f32.mxu1 %v2778_v0 }
 0x55b   :  { %2367 = vmatpush1.bf16.msra.mxu0 %v2880_v28  ;;  %2399 = vmatpush1.bf16.msra.mxu1 %v2887_v32 }
 0x55c   :  { %2369 = vmatprep.subr.bf16.mxu0 %v2891_v36  ;;  %2401 = vmatprep.subr.bf16.mxu1 %v2893_v37 }
 0x55f   :  { %2371 = vmatpush1.bf16.msra.mxu0 %v2897_v41  ;;  %2403 = vmatpush1.bf16.msra.mxu1 %v2904_v45 }
 0x560   :  { %2373 = vmatprep.subr.bf16.mxu0 %v2908_v49  ;;  %2405 = vmatprep.subr.bf16.mxu1 %v2912_v53 }
 0x563   :  { %2375 = vmatpush1.bf16.msra.mxu0 %v2916_v56  ;;  %2407 = vmatpush1.bf16.msra.mxu1 %v2920_v60 }
 0x564   :  { %2377 = vmatprep.subr.bf16.mxu0 %v2927_v1  ;;  %2409 = vmatprep.subr.bf16.mxu1 %v2931_v4 }
 0x567   :  { %2379 = vmatpush1.bf16.msra.mxu0 %v2935_v7  ;;  %2411 = vmatpush1.bf16.msra.mxu1 %v2939_v12 }
 0x568   :  { %2381 = vmatprep.subr.bf16.mxu0 %v2946_v17  ;;  %2413 = vmatprep.subr.bf16.mxu1 %v2950_v21 }
 0x56b   :  { %2383 = vmatpush1.bf16.msra.mxu0 %v2954_v26  ;;  %2415 = vmatpush1.bf16.msra.mxu1 %v2958_v30 }
 0x56c   :  { %2385 = vmatprep.subr.bf16.mxu0 %v2965_v35  ;;  %2417 = vmatprep.subr.bf16.mxu1 %v2969_v40 }
 0x56f   :  { %2387 = vmatpush1.bf16.msra.mxu0 %v2973_v44  ;;  %2419 = vmatpush1.bf16.msra.mxu1 %v2977_v48 }
 0x570   :  { %2389 = vmatprep.subr.bf16.mxu0 %v2984_v54  ;;  %2421 = vmatprep.subr.bf16.mxu1 %v2988_v58 }
 0x573   :  { %2391 = vmatpush1.bf16.msra.mxu0 %v2992_v59  ;;  %2423 = vmatpush1.bf16.msra.mxu1 %v2996_v61 }
 0x574   :  { %2425 = vmatprep.subr.bf16.mxu0 %v2858_v10  ;;  %2457 = vmatprep.subr.bf16.mxu1 %v2860_v11 }
 0x629   :  { %v1316_v57 = vpop.f32.mrb[10].mxu0  ;;  %v1387_v62 = vpop.f32.mrb[10].mxu1 }
 0x62a   :  { %v2530_v63 = vadd.f32 %v1316_v57, %v3046_v6  ;;  %v1318_v2 = vpop.f32.mrb[11].mxu0  ;;  %v1389_v13 = vpop.f32.mrb[11].mxu1  ;;  %v2546_v20 = vadd.f32 %v1387_v62, %v3052_v27  ;;  %v2492_v57 = vpack.c.bf16 %v1779_v9, %v1778_v5  ;;  %v1762_v62 = vld [vmem:[#allocation4 + $0x10] sm:$0xff] }
 0x62b   :  { %v2531_v14 = vadd.f32 %v1318_v2, %v3048_v8  ;;  %v2547_v22 = vadd.f32 %v1389_v13, %v3055_v34  ;;  %v1780_v13 = vld [vmem:[#allocation4 + $0xa0] sm:$0xff] }
 0x62c   :  { %v1931_v16 = vmul.f32 -1.442695, %v2530_v63  ;;  %v1933_v25 = vmul.f32 -1.442695, %v2546_v20  ;;  %v1763_v63 = vld [vmem:[#allocation4 + $0x18] sm:$0xff]  ;;  %v1765_v20 = vld [vmem:[#allocation4 + $0x28] sm:$0xff] }
 0x62d   :  { %v1932_v18 = vmul.f32 -1.442695, %v2531_v14  ;;  %v2494_v2 = vpack.c.bf16 %v1763_v63, %v1762_v62  ;;  %v1781_v14 = vld [vmem:[#allocation4 + $0xa8] sm:$0xff] }
 0x62e   :  { %2672 = vpow2.f32 %v1931_v16  ;;  %v1764_v16 = vld [vmem:[#allocation4 + $0x20] sm:$0xff] }
 0x62f   :  { %2674 = vpow2.f32 %v1932_v18  ;;  %v2496_v18 = vpack.c.bf16 %v1781_v14, %v1780_v13  ;;  %v1940_v13 = vld [vmem:[%s3330_s5] ss:$0 sm:$0xff] }
 0x630   :  { %2676 = vtanh.f32 %v2547_v22  ;;  %v1782_v22 = vld [vmem:[#allocation4 + $0xb0] sm:$0xff] }
 0x631   :  { %2678 = vpow2.f32 %v1933_v25  ;;  %v1783_v25 = vld [vmem:[#allocation4 + $0xb8] sm:$0xff] }
 0x638   :  { %v2673_v10 = vpop.eup %2672 }
 0x639   :  { %v1405_v29 = vadd.f32 1.0, %v2673_v10  ;;  %v2675_v11 = vpop.eup %2674  ;;  %v2498_v10 = vpack.c.bf16 %v1765_v20, %v1764_v16 }
 0x63a   :  { %v1406_v31 = vadd.f32 1.0, %v2675_v11  ;;  %v2677_v33 = vpop.eup %2676  ;;  %v1766_v11 = vld [vmem:[#allocation4 + $0x30] sm:$0xff] }
 0x63b   :  { %2680 = vrcp.f32 %v1405_v29  ;;  %v2679_v38 = vpop.eup %2678  ;;  %v2500_v29 = vpack.c.bf16 %v1783_v25, %v1782_v22 }
 0x63c   :  { %2682 = vrcp.f32 %v1406_v31  ;;  %v1407_v46 = vadd.f32 1.0, %v2679_v38  ;;  %v1767_v31 = vld [vmem:[#allocation4 + $0x38] sm:$0xff]  ;;  %v1785_v38 = vld [vmem:[#allocation4 + $0xc8] sm:$0xff] }
 0x63e   :  { %2684 = vrcp.f32 %v1407_v46  ;;  %v1769_v46 = vld [vmem:[#allocation4 + $0x48] sm:$0xff] }
 0x645   :  { %v2681_v39 = vpop.eup %2680 }
 0x646   :  { %v1416_v42 = vmul.f32 %v2681_v39, %v2677_v33  ;;  %v2683_v43 = vpop.eup %2682  ;;  %v1784_v33 = vld [vmem:[#allocation4 + $0xc0] sm:$0xff]  ;;  %v2502_v39 = vpack.c.bf16 %v1767_v31, %v1766_v11 }
 0x647   :  { %v1415_v47 = vmul.f32 %v2683_v43, %v3226_v55  ;;  %v1768_v43 = vld [vmem:[#allocation4 + $0x40] sm:$0xff] }
 0x648   :  { %v2685_v51 = vpop.eup %2684 }
 0x649   :  { %v3268_v50 = vadd.f32 %v1416_v42, %v1415_v47  ;;  %v2504_v42 = vpack.c.bf16 %v1785_v38, %v1784_v33  ;;  %v2506_v47 = vpack.c.bf16 %v1769_v46, %v1768_v43 }
 0x64b   :  { %2686 = vtanh.f32 %v3268_v50 }
 0x655   :  { %v2687_v52 = vpop.eup %2686 }
 0x656   :  { %v1419_v3 = vmul.f32 %v2687_v52, %v2685_v51  ;;  %v1787_v51 = vld [vmem:[#allocation4 + $0xd8] sm:$0xff] }
 0x658   :  { %1485 = vmatmul.mubr.f32.vlgmr.msra.gmra.mrb[12].mxu0 %v1419_v3  ;;  %1556 = vmatmul.mubr.f32.vlgmr.msra.gmra.mrb[12].mxu1 %v1419_v3  ;;  %v1770_v3 = vld [vmem:[#allocation4 + $0x50] sm:$0xff] }
 0x659   :  { %2427 = vmatpush1.bf16.msra.mxu0 %v2862_v15  ;;  %2459 = vmatpush1.bf16.msra.mxu1 %v2871_v19 }
 0x65a   :  { %2429 = vmatprep.subr.bf16.mxu0 %v2874_v23  ;;  %2461 = vmatprep.subr.bf16.mxu1 %v2876_v24 }
 0x65b   :  { %1654 = vmatprep.mubr.f32.mxu0 %v2778_v0  ;;  %1725 = vmatprep.mubr.f32.mxu1 %v2778_v0 }
 0x65d   :  { %2431 = vmatpush1.bf16.msra.mxu0 %v2880_v28  ;;  %2463 = vmatpush1.bf16.msra.mxu1 %v2887_v32 }
 0x65e   :  { %2433 = vmatprep.subr.bf16.mxu0 %v2891_v36  ;;  %2465 = vmatprep.subr.bf16.mxu1 %v2893_v37 }
 0x661   :  { %2435 = vmatpush1.bf16.msra.mxu0 %v2897_v41  ;;  %2467 = vmatpush1.bf16.msra.mxu1 %v2904_v45 }
 0x662   :  { %2437 = vmatprep.subr.bf16.mxu0 %v2908_v49  ;;  %2469 = vmatprep.subr.bf16.mxu1 %v2912_v53 }
 0x665   :  { %2439 = vmatpush1.bf16.msra.mxu0 %v2916_v56  ;;  %2471 = vmatpush1.bf16.msra.mxu1 %v2920_v60 }
 0x666   :  { %2441 = vmatprep.subr.bf16.mxu0 %v2927_v1  ;;  %2473 = vmatprep.subr.bf16.mxu1 %v2931_v4 }
 0x669   :  { %2443 = vmatpush1.bf16.msra.mxu0 %v2935_v7  ;;  %2475 = vmatpush1.bf16.msra.mxu1 %v2939_v12 }
 0x66a   :  { %2445 = vmatprep.subr.bf16.mxu0 %v2946_v17  ;;  %2477 = vmatprep.subr.bf16.mxu1 %v2950_v21 }
 0x66d   :  { %2447 = vmatpush1.bf16.msra.mxu0 %v2954_v26  ;;  %2479 = vmatpush1.bf16.msra.mxu1 %v2958_v30 }
 0x66e   :  { %2449 = vmatprep.subr.bf16.mxu0 %v2965_v35  ;;  %2481 = vmatprep.subr.bf16.mxu1 %v2969_v40 }
 0x671   :  { %2451 = vmatpush1.bf16.msra.mxu0 %v2973_v44  ;;  %2483 = vmatpush1.bf16.msra.mxu1 %v2977_v48  ;;  %v1776_v48 = vld [vmem:[#allocation4 + $0x80] sm:$0xff] }
 0x672   :  { %2453 = vmatprep.subr.bf16.mxu0 %v2984_v54  ;;  %2485 = vmatprep.subr.bf16.mxu1 %v2988_v58  ;;  %v1777_v54 = vld [vmem:[#allocation4 + $0x88] sm:$0xff] }
 0x673   :  { %v2488_v58 = vpack.c.bf16 %v1777_v54, %v1776_v48 }
 0x675   :  { %2455 = vmatpush1.bf16.msra.mxu0 %v2992_v59  ;;  %2487 = vmatpush1.bf16.msra.mxu1 %v2996_v61  ;;  %v1760_v59 = vld [vmem:[#allocation4] sm:$0xff]  ;;  %v1761_v61 = vld [vmem:[#allocation4 + $0x8] sm:$0xff] }
 0x676   :  { %v2490_v55 = vpack.c.bf16 %v1761_v61, %v1760_v59  ;;  %2489 = vmatprep.subr.bf16.mxu0 %v2488_v58 }
 0x72b   :  { %v1486_v0 = vpop.f32.mrb[12].mxu0  ;;  %v1557_v15 = vpop.f32.mrb[12].mxu1 }
 0x72c   :  { %v2532_v19 = vadd.f32 %v1486_v0, %v3046_v6  ;;  %v1488_v23 = vpop.f32.mrb[13].mxu0  ;;  %v1559_v24 = vpop.f32.mrb[13].mxu1  ;;  %v2548_v37 = vadd.f32 %v1557_v15, %v3052_v27  ;;  %v1771_v0 = vld [vmem:[#allocation4 + $0x58] sm:$0xff] }
 0x72d   :  { %v2533_v28 = vadd.f32 %v1488_v23, %v3048_v8  ;;  %v2549_v41 = vadd.f32 %v1559_v24, %v3055_v34  ;;  %v2510_v15 = vpack.c.bf16 %v1771_v0, %v1770_v3  ;;  %v1789_v23 = vld [vmem:[#allocation4 + $0xe8] sm:$0xff]  ;;  %v1772_v24 = vld [vmem:[#allocation4 + $0x60] sm:$0xff] }
 0x72e   :  { %v1934_v32 = vmul.f32 -1.442695, %v2532_v19  ;;  %v1936_v45 = vmul.f32 -1.442695, %v2548_v37  ;;  %v1788_v19 = vld [vmem:[#allocation4 + $0xe0] sm:$0xff]  ;;  %v1791_v37 = vld [vmem:[#allocation4 + $0xf8] sm:$0xff] }
 0x72f   :  { %v1935_v36 = vmul.f32 -1.442695, %v2533_v28  ;;  %v2512_v28 = vpack.c.bf16 %v1789_v23, %v1788_v19 }
 0x730   :  { %2688 = vpow2.f32 %v1934_v32  ;;  %v1773_v32 = vld [vmem:[#allocation4 + $0x68] sm:$0xff] }
 0x731   :  { %2690 = vpow2.f32 %v1935_v36  ;;  %v1790_v36 = vld [vmem:[#allocation4 + $0xf0] sm:$0xff] }
 0x732   :  { %2692 = vtanh.f32 %v2549_v41  ;;  %v2514_v41 = vpack.c.bf16 %v1773_v32, %v1772_v24 }
 0x733   :  { %2694 = vpow2.f32 %v1936_v45  ;;  %v2516_v45 = vpack.c.bf16 %v1791_v37, %v1790_v36 }
 0x73a   :  { %v2689_v49 = vpop.eup %2688 }
 0x73b   :  { %v1575_v53 = vadd.f32 1.0, %v2689_v49  ;;  %v2691_v56 = vpop.eup %2690  ;;  %v1774_v49 = vld [vmem:[#allocation4 + $0x70] sm:$0xff] }
 0x73c   :  { %v1576_v60 = vadd.f32 1.0, %v2691_v56  ;;  %v2693_v1 = vpop.eup %2692 }
 0x73d   :  { %2696 = vrcp.f32 %v1575_v53  ;;  %v2695_v4 = vpop.eup %2694  ;;  %v1775_v53 = vld [vmem:[#allocation4 + $0x78] sm:$0xff] }
 0x73e   :  { %2698 = vrcp.f32 %v1576_v60  ;;  %v1577_v21 = vadd.f32 1.0, %v2695_v4  ;;  %v2518_v56 = vpack.c.bf16 %v1775_v53, %v1774_v49 }
 0x740   :  { %2700 = vrcp.f32 %v1577_v21 }
 0x747   :  { %v2697_v7 = vpop.eup %2696 }
 0x748   :  { %v1586_v12 = vmul.f32 %v2697_v7, %v2693_v1  ;;  %v2699_v17 = vpop.eup %2698 }
 0x749   :  { %v1585_v26 = vmul.f32 %v2699_v17, %v3268_v50  ;;  %v1786_v50 = vld [vmem:[#allocation4 + $0xd0] sm:$0xff] }
 0x74a   :  { %v2701_v35 = vpop.eup %2700  ;;  %v2508_v52 = vpack.c.bf16 %v1787_v51, %v1786_v50 }
 0x74b   :  { %v3308_v30 = vadd.f32 %v1586_v12, %v1585_v26 }
 0x74d   :  { %2702 = vtanh.f32 %v3308_v30 }
 0x757   :  { %v2703_v40 = vpop.eup %2702 }
 0x758   :  { %v1589_v44 = vmul.f32 %v2703_v40, %v2701_v35 }
 0x75a   :  { %1655 = vmatmul.mubr.f32.vlgmr.msra.gmra.mrb[14].mxu0 %v1589_v44  ;;  %1726 = vmatmul.mubr.f32.vlgmr.msra.gmra.mrb[14].mxu1 %v1589_v44 }
 0x75b   :  { %2491 = vmatpush3.bf16.msra.mxu0 %v2490_v55 }
 0x75c   :  { %2493 = vmatprep.subr.bf16.mxu0 %v2492_v57 }
 0x75f   :  { %2495 = vmatpush3.bf16.msra.mxu0 %v2494_v2 }
 0x760   :  { %2497 = vmatprep.subr.bf16.mxu0 %v2496_v18 }
 0x763   :  { %2499 = vmatpush3.bf16.msra.mxu0 %v2498_v10 }
 0x764   :  { %2501 = vmatprep.subr.bf16.mxu0 %v2500_v29 }
 0x767   :  { %2503 = vmatpush3.bf16.msra.mxu0 %v2502_v39 }
 0x768   :  { %2505 = vmatprep.subr.bf16.mxu0 %v2504_v42 }
 0x76b   :  { %2507 = vmatpush3.bf16.msra.mxu0 %v2506_v47 }
 0x76c   :  { %2509 = vmatprep.subr.bf16.mxu0 %v2508_v52 }
 0x76f   :  { %2511 = vmatpush3.bf16.msra.mxu0 %v2510_v15 }
 0x770   :  { %2513 = vmatprep.subr.bf16.mxu0 %v2512_v28 }
 0x773   :  { %2515 = vmatpush3.bf16.msra.mxu0 %v2514_v41 }
 0x774   :  { %2517 = vmatprep.subr.bf16.mxu0 %v2516_v45 }
 0x777   :  { %2519 = vmatpush3.bf16.msra.mxu0 %v2518_v56 }
 0x82d   :  { %v1656_v60 = vpop.f32.mrb[14].mxu0  ;;  %v1727_v1 = vpop.f32.mrb[14].mxu1 }
 0x82e   :  { %v2534_v4 = vadd.f32 %v1656_v60, %v3046_v6  ;;  %v1658_v7 = vpop.f32.mrb[15].mxu0  ;;  %v1729_v12 = vpop.f32.mrb[15].mxu1  ;;  %v2550_v35 = vadd.f32 %v1727_v1, %v3052_v27 }
 0x82f   :  { %v2535_v17 = vadd.f32 %v1658_v7, %v3048_v8  ;;  %v2551_v40 = vadd.f32 %v1729_v12, %v3055_v34 }
 0x830   :  { %v1937_v21 = vmul.f32 -1.442695, %v2534_v4  ;;  %v1939_v44 = vmul.f32 -1.442695, %v2550_v35 }
 0x831   :  { %v1938_v26 = vmul.f32 -1.442695, %v2535_v17 }
 0x832   :  { %2704 = vpow2.f32 %v1937_v21 }
 0x833   :  { %2706 = vpow2.f32 %v1938_v26 }
 0x834   :  { %2708 = vtanh.f32 %v2551_v40 }
 0x835   :  { %2710 = vpow2.f32 %v1939_v44 }
 0x83c   :  { %v2705_v48 = vpop.eup %2704 }
 0x83d   :  { %v1745_v54 = vadd.f32 1.0, %v2705_v48  ;;  %v2707_v58 = vpop.eup %2706 }
 0x83e   :  { %v1746_v6 = vadd.f32 1.0, %v2707_v58  ;;  %v2709_v59 = vpop.eup %2708 }
 0x83f   :  { %2712 = vrcp.f32 %v1745_v54  ;;  %v2711_v61 = vpop.eup %2710 }
 0x840   :  { %2714 = vrcp.f32 %v1746_v6  ;;  %v1747_v9 = vadd.f32 1.0, %v2711_v61 }
 0x842   :  { %2716 = vrcp.f32 %v1747_v9 }
 0x849   :  { %v2713_v8 = vpop.eup %2712 }
 0x84a   :  { %v1756_v55 = vmul.f32 %v2713_v8, %v2709_v59  ;;  %v2715_v5 = vpop.eup %2714 }
 0x84b   :  { %v1755_v57 = vmul.f32 %v2715_v5, %v3308_v30 }
 0x84c   :  { %v2717_v34 = vpop.eup %2716 }
 0x84d   :  { %v1757_v27 = vadd.f32 %v1756_v55, %v1755_v57 }
 0x84f   :  { %2718 = vtanh.f32 %v1757_v27  ;;  %1863 = vmatprep.mubr.f32.mxu0 %v1757_v27 }
 0x859   :  { %v2719_v62 = vpop.eup %2718 }
 0x85a   :  { %v1759_v63 = vmul.f32 %v2719_v62, %v2717_v34 }
 0x85c   :  { %1864 = vmatmul.mubr.f32.vlgmr.msra.gmra.mrb[16].mxu0 %v1759_v63 }
 0x92f   :  { %v1973_v2 = vpop.f32.mrb[16].mxu0 }
 0x930   :  { %v1974_v14 = vpop.f32.mrb[17].mxu0 }
 0x931   :  { %v1975_v16 = vadd.f32 %v1974_v14, %v1973_v2 }
 0x933   :  { %v1866_v18 = vadd.f32 %v1975_v16, %v1940_v13 }
 0x935   :  { %1888 = vst [vmem:[%s3331_s6] sm:$0xff] %v1866_v18  ;;  %v1870_v30 = vsel %vm1869_vm1, %v1866_v18, -inf }
 0x936   :  { %1871 = vmax.xlane.f32.xlu0 %v1870_v30 }
 0x9c3   :  { %v1872_v20 = vpop.xlane.xlu0 %1871 }
 0x9c4   :  { %v1873_v22 = vsub.f32 %v1866_v18, %v1872_v20 }
 0x9c6   :  { %v1874_v25 = vmul.f32 1.442695, %v1873_v22 }
 0x9c8   :  { %2720 = vpow2.f32 %v1874_v25 }
 0x9d2   :  { %v2721_v10 = vpop.eup %2720 }
 0x9d3   :  { %1877 = vrot.lane.b32.xlu0 %v2721_v10, %s2779_s25 }
 0xa45   :  { %v1878_v29 = vpop.permute.xlu0 %1877 }
 0xa46   :  { %v1881_v11 = vsel %vm1880_vm2, %v1878_v29, 0.0 }
 0xa47   :  { %1882 = vadd.xlane.f32.xlu1 %v1881_v11 }
 0xad4   :  { %v1883_v31 = vpop.xlane.xlu1 %1882 }
 0xad5   :  { %2722 = vlog2.f32 %v1883_v31 }
 0xadf   :  { %v2723_v33 = vpop.eup %2722 }
 0xae0   :  { %v1885_v38 = vmul.f32 0.6931472, %v2723_v33 }
 0xae2   :  { %v1886_v39 = vadd.f32 %v1885_v38, %v1872_v20 }
 0xae4   :  { %v1887_v42 = vsub.f32 %v1866_v18, %v1886_v39 }
 0xae6   :  { %1890 = vrot.lane.b32.xlu1 %v1887_v42, %s2779_s25 }
 0xb58   :  { %v1891_v43 = vpop.permute.xlu1 %1890 }
 0xb59   :  { %1893 = vst.msk [vmem:[%s3331_s6 + $0x2] sm:$0x1] %vm1880_vm2, %v1891_v43 }
 0xb5a   :  { %1898 = vsyncpa [#allocation3], 1 }
 0xb5b   :  { %1899 = vsyncpa [#allocation5], 1 }

</bundles_post_ra>
